<compile_context>
chip_gen: v5e
topology: v5e:2x2
jax: 0.10.0
libtpu: 0.0.40
codegen_flags: <defaults>
</compile_context>

<pallas_src>
import functools
import math

import jax
import jax.numpy as jnp
from jax.experimental import pallas as pl
from jax.experimental.pallas import tpu as pltpu


def _round_up(x, m):
    return ((x + m - 1) // m) * m


def _ntxent_kernel(zr_ref, zc_ref, o_ref, rown_ref, m_ref, l_ref, pos_ref, *,
                   half, n_valid, n_pad, tile_m, tile_n, inv_temp):
    """One (row-tile, col-tile) step of the flash-style NTXent forward."""
    i = pl.program_id(0)          # row-tile index  ("parallel")
    k = pl.program_id(1)          # col-tile index  (reduction, innermost)

    neg_inf = jnp.float32(-jnp.inf)
    needs_mask = (n_valid != n_pad)            # static Python bool: padding present?

    row_ids = i * tile_m + jax.lax.broadcasted_iota(jnp.int32, (tile_m, 1), 0)
    col_ids = k * tile_n + jax.lax.broadcasted_iota(jnp.int32, (1, tile_n), 1)

    # ---- per-row-tile init (first column step) ------------------------------
    @pl.when(k == 0)
    def _init():
        # Rows are pre-L2-normalized; fold 1/temperature in once per row tile.
        rown_ref[...] = zr_ref[...] * inv_temp
        m_ref[...] = jnp.full((tile_m, 1), neg_inf, jnp.float32)
        l_ref[...] = jnp.zeros((tile_m, 1), jnp.float32)
        pos_ref[...] = jnp.zeros((tile_m, 1), jnp.float32)

    # ---- similarity tile on the MXU: (TM, TN) = (rows / T) . cols^T ----------
    s = jax.lax.dot_general(rown_ref[...], zc_ref[...],
                            (((1,), (1,)), ((), ())),
                            preferred_element_type=jnp.float32)

    # ---- positive-pair logit (exactly one hit per valid row over the sweep) --
    pos_col = jnp.where(row_ids < half, row_ids + half, row_ids - half)    # (TM,1)
    pos_mask = col_ids == pos_col                                          # (TM,TN)
    pos_ref[...] += jnp.sum(jnp.where(pos_mask, s, 0.0), axis=-1, keepdims=True)

    # ---- online log-sum-exp over all valid j != i -----------------------------
    neg_ok = row_ids != col_ids
    if needs_mask:
        neg_ok = jnp.logical_and(neg_ok, col_ids < n_valid)
    s_m = jnp.where(neg_ok, s, neg_inf)

    m_prev = m_ref[...]
    m_new = jnp.maximum(m_prev, jnp.max(s_m, axis=-1, keepdims=True))
    l_ref[...] = (l_ref[...] * jnp.exp(m_prev - m_new)
                  + jnp.sum(jnp.exp(s_m - m_new), axis=-1, keepdims=True))
    m_ref[...] = m_new

    # ---- finalize this row tile (last column step) ----------------------------
    @pl.when(k == pl.num_programs(1) - 1)
    def _fin():
        lse = m_ref[...] + jnp.log(l_ref[...])
        loss = lse - pos_ref[...]
        if needs_mask:
            loss = loss * (row_ids < n_valid).astype(jnp.float32)   # padded rows -> 0
        o_ref[...] = loss


def ntxent_pallas(z_i, z_j, temperature=1.0, eps=1e-8, *, tile_m=128, tile_n=128):
    """NTXent / SimCLR loss. z_i, z_j: (B, D). Returns a scalar f32 loss."""
    B, D = z_i.shape
    n = 2 * B
    d_pad = _round_up(max(D, 128), 128)                   # lane-dense feature dim
    lcm = tile_m * tile_n // math.gcd(tile_m, tile_n)
    n_pad = _round_up(max(n, lcm), lcm)

    # Glue (single fused XLA op): concat, L2-normalize ONCE, zero-pad.  Doing the
    # normalization here removes the redundant per-grid-step rsqrt + scale on the
    # column operand that the previous kernel performed.
    z = jnp.concatenate([z_i, z_j], axis=0).astype(jnp.float32)
    inv_norm = jax.lax.rsqrt(
        jnp.maximum(jnp.sum(z * z, axis=-1, keepdims=True), jnp.float32(eps) ** 2))
    zn = z * inv_norm
    zp = jnp.zeros((n_pad, d_pad), jnp.float32)
    zp = jax.lax.dynamic_update_slice(zp, zn, (0, 0))
    # TODO(synk): fold this concat/normalize/pad into a manual-DMA preprocess
    # kernel to save one HBM round-trip of the embeddings.

    grid = (n_pad // tile_m, n_pad // tile_n)
    per_row = pl.pallas_call(
        functools.partial(
            _ntxent_kernel, half=B, n_valid=n, n_pad=n_pad,
            tile_m=tile_m, tile_n=tile_n, inv_temp=float(1.0 / temperature)),
        out_shape=jax.ShapeDtypeStruct((n_pad, 1), jnp.float32),
        grid_spec=pltpu.PrefetchScalarGridSpec(
            num_scalar_prefetch=0,
            grid=grid,
            in_specs=[pl.BlockSpec((tile_m, d_pad), lambda i, k: (i, 0)),   # row tile
                      pl.BlockSpec((tile_n, d_pad), lambda i, k: (k, 0))],  # col tile
            out_specs=pl.BlockSpec((tile_m, 1), lambda i, k: (i, 0)),
            scratch_shapes=[pltpu.VMEM((tile_m, d_pad), jnp.float32),  # rows * (1/T)
                            pltpu.VMEM((tile_m, 1), jnp.float32),      # running max
                            pltpu.VMEM((tile_m, 1), jnp.float32),      # running exp-sum
                            pltpu.VMEM((tile_m, 1), jnp.float32)]),    # positive logit
        compiler_params=pltpu.CompilerParams(
            dimension_semantics=("parallel", "arbitrary")),
    )(zp, zp)

    return jnp.sum(per_row) / jnp.float32(n)


def ntxent_ref(z_i, z_j, temperature=1.0, eps=1e-8):
    """Pure-JAX reference mirroring the PyTorch module."""
    z = jnp.concatenate([z_i, z_j], axis=0).astype(jnp.float32)
    B = z_i.shape[0]
    n = 2 * B
    norm = jnp.sqrt(jnp.sum(z * z, axis=1))
    denom = jnp.maximum(norm[:, None] * norm[None, :], eps)
    sim = (z @ z.T) / denom / temperature
    pos = jnp.concatenate([jnp.diagonal(sim, B), jnp.diagonal(sim, -B)])
    sim_m = jnp.where(jnp.eye(n, dtype=bool), -jnp.inf, sim)
    lse = jax.scipy.special.logsumexp(sim_m, axis=1)
    return jnp.mean(lse - pos)


if __name__ == "__main__":
    key = jax.random.PRNGKey(0)
    k1, k2, k3, k4, k5, k6 = jax.random.split(key, 6)

    # Case 1: shapes from the original module test (single-tile grid, padded D and N).
    B, D, temp = 8, 32, 0.5
    z_i = jax.random.normal(k1, (B, D), dtype=jnp.float32)
    z_j = jax.random.normal(k2, (B, D), dtype=jnp.float32)
    loss = jax.block_until_ready(ntxent_pallas(z_i, z_j, temperature=temp))
    ref = jax.block_until_ready(ntxent_ref(z_i, z_j, temperature=temp))
    assert jnp.allclose(loss, ref, rtol=1e-5, atol=1e-5), (loss, ref)

    # Case 2: multi-tile grid (2x2), non-multiple sizes to exercise the masking paths.
    B2, D2, temp2 = 72, 48, 0.2
    z_i2 = jax.random.normal(k3, (B2, D2), dtype=jnp.float32)
    z_j2 = jax.random.normal(k4, (B2, D2), dtype=jnp.float32)
    loss2 = jax.block_until_ready(ntxent_pallas(z_i2, z_j2, temperature=temp2))
    ref2 = jax.block_until_ready(ntxent_ref(z_i2, z_j2, temperature=temp2))
    assert jnp.allclose(loss2, ref2, rtol=1e-5, atol=1e-5), (loss2, ref2)

    # Case 3: tile-aligned sizes (2B == n_pad) to exercise the mask-free fast path.
    B3, D3, temp3 = 128, 64, 0.1
    z_i3 = jax.random.normal(k5, (B3, D3), dtype=jnp.float32)
    z_j3 = jax.random.normal(k6, (B3, D3), dtype=jnp.float32)
    loss3 = jax.block_until_ready(ntxent_pallas(z_i3, z_j3, temperature=temp3))
    ref3 = jax.block_until_ready(ntxent_ref(z_i3, z_j3, temperature=temp3))
    assert jnp.allclose(loss3, ref3, rtol=1e-5, atol=1e-5), (loss3, ref3)

    print("KERNEL_OK")
</pallas_src>

<mosaic_0001>
module attributes {stable_mosaic.version = 11 : i64} {
  func.func @_ntxent_kernel(%arg0: i32, %arg1: i32, %arg2: memref<128x128xf32, #tpu.memory_space<vmem>>, %arg3: memref<128x128xf32, #tpu.memory_space<vmem>>, %arg4: memref<128x1xf32, #tpu.memory_space<vmem>>, %arg5: memref<128x128xf32, #tpu.memory_space<vmem>>, %arg6: memref<128x1xf32, #tpu.memory_space<vmem>>, %arg7: memref<128x1xf32, #tpu.memory_space<vmem>>, %arg8: memref<128x1xf32, #tpu.memory_space<vmem>>) attributes {dimension_semantics = [#tpu.dimension_semantics<parallel>, #tpu.dimension_semantics<arbitrary>], iteration_bounds = array<i64: 1, 1>, scalar_prefetch = 0 : i64, scratch_operands = 4 : i64, tpu.core_type = #tpu.core_type<tc>, window_params = [{transform_indices = @transform_0, window_bounds = array<i64: 128, 128>}, {transform_indices = @transform_1, window_bounds = array<i64: 128, 128>}, {transform_indices = @transform_2, window_bounds = array<i64: 128, 1>}]} {
    %c128_i32 = arith.constant 128 : i32
    %0 = arith.muli %arg0, %c128_i32 : i32
    %1 = tpu.iota {dimensions = array<i32: 0>} : vector<128x1xi32>
    %2 = vector.broadcast %0 : i32 to vector<128x1xi32>
    %3 = arith.addi %2, %1 : vector<128x1xi32>
    %c128_i32_0 = arith.constant 128 : i32
    %4 = arith.muli %arg1, %c128_i32_0 : i32
    %5 = tpu.iota {dimensions = array<i32: 1>} : vector<1x128xi32>
    %6 = vector.broadcast %4 : i32 to vector<1x128xi32>
    %7 = arith.addi %6, %5 : vector<1x128xi32>
    %c0_i32 = arith.constant 0 : i32
    %8 = arith.cmpi eq, %arg1, %c0_i32 : i32
    %9 = arith.extui %8 : i1 to i32
    %cst = arith.constant 0xFF800000 : f32
    %c0_i32_1 = arith.constant 0 : i32
    %10 = arith.cmpi ne, %9, %c0_i32_1 : i32
    scf.if %10 {
      %c0_27 = arith.constant 0 : index
      %c0_28 = arith.constant 0 : index
      %59 = vector.load %arg2[%c0_27, %c0_28] : memref<128x128xf32, #tpu.memory_space<vmem>>, vector<128x128xf32>
      %cst_29 = arith.constant 2.000000e+00 : f32
      %60 = vector.broadcast %cst_29 : f32 to vector<128x128xf32>
      %61 = arith.mulf %59, %60 : vector<128x128xf32>
      %c0_30 = arith.constant 0 : index
      %c0_31 = arith.constant 0 : index
      %62 = vector.load %arg5[%c0_30, %c0_31] : memref<128x128xf32, #tpu.memory_space<vmem>>, vector<128x128xf32>
      tpu.vector_store %arg5[%c0_30, %c0_31], %61 {strides = array<i32>} : memref<128x128xf32, #tpu.memory_space<vmem>>, vector<128x128xf32>,
      %63 = vector.broadcast %cst : f32 to vector<128x1xf32>
      %c0_32 = arith.constant 0 : index
      %c0_33 = arith.constant 0 : index
      %64 = vector.load %arg6[%c0_32, %c0_33] : memref<128x1xf32, #tpu.memory_space<vmem>>, vector<128x1xf32>
      tpu.vector_store %arg6[%c0_32, %c0_33], %63 {strides = array<i32>} : memref<128x1xf32, #tpu.memory_space<vmem>>, vector<128x1xf32>,
      %cst_34 = arith.constant 0.000000e+00 : f32
      %65 = vector.broadcast %cst_34 : f32 to vector<128x1xf32>
      %c0_35 = arith.constant 0 : index
      %c0_36 = arith.constant 0 : index
      %66 = vector.load %arg7[%c0_35, %c0_36] : memref<128x1xf32, #tpu.memory_space<vmem>>, vector<128x1xf32>
      tpu.vector_store %arg7[%c0_35, %c0_36], %65 {strides = array<i32>} : memref<128x1xf32, #tpu.memory_space<vmem>>, vector<128x1xf32>,
      %cst_37 = arith.constant 0.000000e+00 : f32
      %67 = vector.broadcast %cst_37 : f32 to vector<128x1xf32>
      %c0_38 = arith.constant 0 : index
      %c0_39 = arith.constant 0 : index
      %68 = vector.load %arg8[%c0_38, %c0_39] : memref<128x1xf32, #tpu.memory_space<vmem>>, vector<128x1xf32>
      tpu.vector_store %arg8[%c0_38, %c0_39], %67 {strides = array<i32>} : memref<128x1xf32, #tpu.memory_space<vmem>>, vector<128x1xf32>,
    } else {
    }
    %c0 = arith.constant 0 : index
    %c0_2 = arith.constant 0 : index
    %11 = vector.load %arg5[%c0, %c0_2] : memref<128x128xf32, #tpu.memory_space<vmem>>, vector<128x128xf32>
    %c0_3 = arith.constant 0 : index
    %c0_4 = arith.constant 0 : index
    %12 = vector.load %arg3[%c0_3, %c0_4] : memref<128x128xf32, #tpu.memory_space<vmem>>, vector<128x128xf32>
    %cst_5 = arith.constant dense<0.000000e+00> : vector<128x128xf32>
    %13 = tpu.matmul %11, %12, %cst_5 {dimension_numbers = #tpu.dot_dimension_numbers<[1], [1], [0], [0], [0, 0, 1, 0], [], []>} : vector<128x128xf32>, vector<128x128xf32>, vector<128x128xf32> -> vector<128x128xf32>
    %c8_i32 = arith.constant 8 : i32
    %14 = vector.broadcast %c8_i32 : i32 to vector<128x1xi32>
    %15 = arith.cmpi slt, %3, %14 : vector<128x1xi32>
    %c8_i32_6 = arith.constant 8 : i32
    %16 = vector.broadcast %c8_i32_6 : i32 to vector<128x1xi32>
    %17 = arith.addi %3, %16 : vector<128x1xi32>
    %c8_i32_7 = arith.constant 8 : i32
    %18 = vector.broadcast %c8_i32_7 : i32 to vector<128x1xi32>
    %19 = arith.subi %3, %18 : vector<128x1xi32>
    %20 = arith.select %15, %17, %19 : vector<128x1xi1>, vector<128x1xi32>
    %21 = vector.broadcast %7 : vector<1x128xi32> to vector<128x128xi32>
    %22 = vector.broadcast %20 : vector<128x1xi32> to vector<128x128xi32>
    %23 = arith.cmpi eq, %21, %22 : vector<128x128xi32>
    %c0_8 = arith.constant 0 : index
    %c0_9 = arith.constant 0 : index
    %24 = vector.load %arg8[%c0_8, %c0_9] : memref<128x1xf32, #tpu.memory_space<vmem>>, vector<128x1xf32>
    %cst_10 = arith.constant 0.000000e+00 : f32
    %25 = vector.broadcast %cst_10 : f32 to vector<128x128xf32>
    %26 = arith.select %23, %13, %25 : vector<128x128xi1>, vector<128x128xf32>
    %cst_11 = arith.constant dense<0.000000e+00> : vector<128xf32>
    %27 = vector.multi_reduction <add>, %26, %cst_11 [1] : vector<128x128xf32> to vector<128xf32>
    %28 = vector.shape_cast %27 : vector<128xf32> to vector<128x1xf32>
    %29 = arith.addf %24, %28 : vector<128x1xf32>
    %c0_12 = arith.constant 0 : index
    %c0_13 = arith.constant 0 : index
    %30 = vector.load %arg8[%c0_12, %c0_13] : memref<128x1xf32, #tpu.memory_space<vmem>>, vector<128x1xf32>
    tpu.vector_store %arg8[%c0_12, %c0_13], %29 {strides = array<i32>} : memref<128x1xf32, #tpu.memory_space<vmem>>, vector<128x1xf32>,
    %31 = vector.broadcast %3 : vector<128x1xi32> to vector<128x128xi32>
    %32 = vector.broadcast %7 : vector<1x128xi32> to vector<128x128xi32>
    %33 = arith.cmpi ne, %31, %32 : vector<128x128xi32>
    %c16_i32 = arith.constant 16 : i32
    %34 = vector.broadcast %c16_i32 : i32 to vector<1x128xi32>
    %35 = arith.cmpi slt, %7, %34 : vector<1x128xi32>
    %36 = vector.broadcast %35 : vector<1x128xi1> to vector<128x128xi1>
    %37 = arith.andi %33, %36 : vector<128x128xi1>
    %cst_14 = arith.constant 0xFF800000 : f32
    %38 = vector.broadcast %cst_14 : f32 to vector<128x128xf32>
    %39 = arith.select %37, %13, %38 : vector<128x128xi1>, vector<128x128xf32>
    %c0_15 = arith.constant 0 : index
    %c0_16 = arith.constant 0 : index
    %40 = vector.load %arg6[%c0_15, %c0_16] : memref<128x1xf32, #tpu.memory_space<vmem>>, vector<128x1xf32>
    %cst_17 = arith.constant dense<0xFF800000> : vector<128xf32>
    %41 = vector.multi_reduction <maximumf>, %39, %cst_17 [1] : vector<128x128xf32> to vector<128xf32>
    %42 = vector.shape_cast %41 : vector<128xf32> to vector<128x1xf32>
    %43 = arith.maximumf %40, %42 : vector<128x1xf32>
    %c0_18 = arith.constant 0 : index
    %c0_19 = arith.constant 0 : index
    %44 = vector.load %arg7[%c0_18, %c0_19] : memref<128x1xf32, #tpu.memory_space<vmem>>, vector<128x1xf32>
    %45 = arith.subf %40, %43 : vector<128x1xf32>
    %46 = math.exp %45 : vector<128x1xf32>
    %47 = arith.mulf %44, %46 : vector<128x1xf32>
    %48 = vector.broadcast %43 : vector<128x1xf32> to vector<128x128xf32>
    %49 = arith.subf %39, %48 : vector<128x128xf32>
    %50 = math.exp %49 : vector<128x128xf32>
    %cst_20 = arith.constant dense<0.000000e+00> : vector<128xf32>
    %51 = vector.multi_reduction <add>, %50, %cst_20 [1] : vector<128x128xf32> to vector<128xf32>
    %52 = vector.shape_cast %51 : vector<128xf32> to vector<128x1xf32>
    %53 = arith.addf %47, %52 : vector<128x1xf32>
    %c0_21 = arith.constant 0 : index
    %c0_22 = arith.constant 0 : index
    %54 = vector.load %arg7[%c0_21, %c0_22] : memref<128x1xf32, #tpu.memory_space<vmem>>, vector<128x1xf32>
    tpu.vector_store %arg7[%c0_21, %c0_22], %53 {strides = array<i32>} : memref<128x1xf32, #tpu.memory_space<vmem>>, vector<128x1xf32>,
    %c0_23 = arith.constant 0 : index
    %c0_24 = arith.constant 0 : index
    %55 = vector.load %arg6[%c0_23, %c0_24] : memref<128x1xf32, #tpu.memory_space<vmem>>, vector<128x1xf32>
    tpu.vector_store %arg6[%c0_23, %c0_24], %43 {strides = array<i32>} : memref<128x1xf32, #tpu.memory_space<vmem>>, vector<128x1xf32>,
    %c0_i32_25 = arith.constant 0 : i32
    %56 = arith.cmpi eq, %arg1, %c0_i32_25 : i32
    %57 = arith.extui %56 : i1 to i32
    %c0_i32_26 = arith.constant 0 : i32
    %58 = arith.cmpi ne, %57, %c0_i32_26 : i32
    scf.if %58 {
      %c0_27 = arith.constant 0 : index
      %c0_28 = arith.constant 0 : index
      %59 = vector.load %arg6[%c0_27, %c0_28] : memref<128x1xf32, #tpu.memory_space<vmem>>, vector<128x1xf32>
      %c0_29 = arith.constant 0 : index
      %c0_30 = arith.constant 0 : index
      %60 = vector.load %arg7[%c0_29, %c0_30] : memref<128x1xf32, #tpu.memory_space<vmem>>, vector<128x1xf32>
      %61 = math.log %60 : vector<128x1xf32>
      %62 = arith.addf %59, %61 : vector<128x1xf32>
      %c0_31 = arith.constant 0 : index
      %c0_32 = arith.constant 0 : index
      %63 = vector.load %arg8[%c0_31, %c0_32] : memref<128x1xf32, #tpu.memory_space<vmem>>, vector<128x1xf32>
      %64 = arith.subf %62, %63 : vector<128x1xf32>
      %c16_i32_33 = arith.constant 16 : i32
      %65 = vector.broadcast %c16_i32_33 : i32 to vector<128x1xi32>
      %66 = arith.cmpi slt, %3, %65 : vector<128x1xi32>
      %67 = arith.extui %66 : vector<128x1xi1> to vector<128x1xi32>
      %68 = arith.sitofp %67 : vector<128x1xi32> to vector<128x1xf32>
      %69 = arith.mulf %64, %68 : vector<128x1xf32>
      %c0_34 = arith.constant 0 : index
      %c0_35 = arith.constant 0 : index
      %70 = vector.load %arg4[%c0_34, %c0_35] : memref<128x1xf32, #tpu.memory_space<vmem>>, vector<128x1xf32>
      tpu.vector_store %arg4[%c0_34, %c0_35], %69 {strides = array<i32>} : memref<128x1xf32, #tpu.memory_space<vmem>>, vector<128x1xf32>,
    } else {
    }
    return
  }
  func.func @transform_0(%arg0: i32, %arg1: i32) -> (i32, i32) {
    %c0_i32 = arith.constant 0 : i32
    %c0_i32_0 = arith.constant 0 : i32
    return %arg0, %c0_i32 : i32, i32
  }
  func.func @transform_1(%arg0: i32, %arg1: i32) -> (i32, i32) {
    %c0_i32 = arith.constant 0 : i32
    %c0_i32_0 = arith.constant 0 : i32
    return %arg1, %c0_i32 : i32, i32
  }
  func.func @transform_2(%arg0: i32, %arg1: i32) -> (i32, i32) {
    %c0_i32 = arith.constant 0 : i32
    %c0_i32_0 = arith.constant 0 : i32
    return %arg0, %c0_i32 : i32, i32
  }
}

</mosaic_0001>

<bundles_post_ra>
// kernel: tpu_custom_call.1
= control target key start
LH: loop header
LB: loop body
LE: loop exit
PB: predicated region body
PF: predicated region fallthrough
CT: control target
= control target key end

     0   :  { %7 = vsyncpa [#allocation7], 0  ;;  %s1853_s0 = inlined_call_operand.hbm [shape: f32[128,128], index: 0, kind: input, shape index: {}]   ;;  %s1854_s1 = inlined_call_operand.hbm [shape: f32[128,128], index: 1, kind: input, shape index: {}]   ;;  %s1855_s2 = inlined_call_operand.vmem [shape: f32[128,1], index: 2, kind: output, shape index: {}]  }
   0x1   :  { %s13_s11 = sshll.u32 %s1853_s0, 4  ;;  %s14_s11 = int_to_ptr.hbm [resolvable:$true] %s13_s11 }
   0x2   :  { %8 = vsyncpa [#allocation9], 0  ;;  %s1284_s12 = smov [#allocation6]   ;;  %s26_s16 = sshll.u32 %s1854_s1, 4  ;;  %s27_s16 = int_to_ptr.hbm [resolvable:$true] %s26_s16 }
   0x3   :  { %s15_s13 = sshll.u32 %s1284_s12, 4  ;;  %s1285_s17 = smov 128   ;;  %s16_s13 = int_to_ptr.vmem [resolvable:$true] %s15_s13 }
   0x4   :  { %s1286_s18 = smov 8   ;;  %s1287_s19 = smov [#allocation8]  }
   0x5   :  { %21 = dma.hbm_to_vmem [thread:$0]  %s14_s11, 2048, %s16_s13, [#allocation7], %s1285_s17, %s1285_s17, %s1286_s18  }
   0x6   :  { %s28_s20 = sshll.u32 %s1287_s19, 4  ;;  %s29_s20 = int_to_ptr.vmem [resolvable:$true] %s28_s20 }
   0x7   :  { %34 = dma.hbm_to_vmem [thread:$0]  %s27_s16, 2048, %s29_s20, [#allocation9], %s1285_s17, %s1285_s17, %s1286_s18  }
   0x8   :  { %1280 = dma.done.wait [#allocation7], 2048  }
   0x9   :  { %1281 = vsyncadd [#allocation7], 4294965248 }
   0xa   :  { %1282 = dma.done.wait [#allocation9], 2048  }
   0xb   :  { %1283 = vsyncadd [#allocation9], 4294965248  ;;  %v215_v0 = vld [vmem:[#allocation8 + $0x78] sm:$0xff]  ;;  %v214_v1 = vld [vmem:[#allocation8 + $0x70] sm:$0xff]  ;;  %v44_v48 = vlaneseq }
   0xc   :  { %216 = vmatpush.xpose.msra.mxu0 %v215_v0  ;;  %1078 = vmatpush.xpose.msra.mxu1 %v215_v0  ;;  %v213_v2 = vld [vmem:[#allocation8 + $0x68] sm:$0xff]  ;;  %v212_v3 = vld [vmem:[#allocation8 + $0x60] sm:$0xff]  ;;  %v211_v4 = vld [vmem:[#allocation8 + $0x58] sm:$0xff] }
   0xd   :  { %1080 = vmatpush.xpose.msra.mxu3 %v215_v0  ;;  %1079 = vmatpush.xpose.msra.mxu2 %v215_v0  ;;  %v210_v5 = vld [vmem:[#allocation8 + $0x50] sm:$0xff]  ;;  %v209_v6 = vld [vmem:[#allocation8 + $0x48] sm:$0xff]  ;;  %v208_v7 = vld [vmem:[#allocation8 + $0x40] sm:$0xff]  ;;  %v1312_v49 = vshrl.u32 %v44_v48, 7  ;;  %v1315_v51 = vand.u32 127, %v44_v48 }
   0xe   :  { %v207_v8 = vld [vmem:[#allocation8 + $0x38] sm:$0xff]  ;;  %v206_v9 = vld [vmem:[#allocation8 + $0x30] sm:$0xff]  ;;  %v205_v10 = vld [vmem:[#allocation8 + $0x28] sm:$0xff] }
   0xf   :  { %v204_v11 = vld [vmem:[#allocation8 + $0x20] sm:$0xff]  ;;  %v203_v12 = vld [vmem:[#allocation8 + $0x18] sm:$0xff]  ;;  %v202_v13 = vld [vmem:[#allocation8 + $0x10] sm:$0xff]  ;;  %v49_v50 = vadd.s32 32, %v1312_v49  ;;  %v1318_v53 = vadd.s32 8, %v1312_v49  ;;  %vm458_vm0 = vcmp.ne.s32.totalorder %v1312_v49, %v1315_v51  ;;  %vm474_vm1 = vcmp.lt.s32.totalorder %v1315_v51, 16 }
  0x10   :  { %217 = vmatpush.xpose.msra.mxu0 %v214_v1  ;;  %1081 = vmatpush.xpose.msra.mxu1 %v214_v1  ;;  %v201_v14 = vld [vmem:[#allocation8 + $0x8] sm:$0xff]  ;;  %v87_v15 = vld [vmem:[#allocation6] sm:$0xff]  ;;  %v89_v32 = vld [vmem:[#allocation6 + $0x10] sm:$0xff]  ;;  %v57_v54 = vadd.s32 96, %v1312_v49  ;;  %v53_v61 = vadd.s32 64, %v1312_v49  ;;  %v58_v62 = vadd.s32 104, %v1312_v49 }
  0x11   :  { %1083 = vmatpush.xpose.msra.mxu3 %v214_v1  ;;  %1082 = vmatpush.xpose.msra.mxu2 %v214_v1  ;;  %v91_v16 = vld [vmem:[#allocation6 + $0x20] sm:$0xff]  ;;  %v103_v20 = vmul.f32 2.0, %v87_v15  ;;  %v88_v24 = vld [vmem:[#allocation6 + $0x8] sm:$0xff]  ;;  %v93_v33 = vld [vmem:[#allocation6 + $0x30] sm:$0xff]  ;;  %v105_v36 = vmul.f32 2.0, %v89_v32  ;;  %v1066_v52 = vadd.s32 4294967288, %v49_v50  ;;  %vm345_vm4 = vcmp.eq.s32.totalorder %v1315_v51, %v1318_v53 }
  0x12   :  { %v200_v17 = vld [vmem:[#allocation8] sm:$0xff]  ;;  %v107_v21 = vmul.f32 2.0, %v91_v16  ;;  %v92_v25 = vld [vmem:[#allocation6 + $0x28] sm:$0xff]  ;;  %v104_v28 = vmul.f32 2.0, %v88_v24  ;;  %v97_v34 = vld [vmem:[#allocation6 + $0x50] sm:$0xff]  ;;  %v109_v37 = vmul.f32 2.0, %v93_v33  ;;  %vm462_vm5 = vcmp.ne.s32.totalorder %v49_v50, %v1315_v51 }
  0x13   :  { %v99_v18 = vld [vmem:[#allocation6 + $0x60] sm:$0xff]  ;;  %v100_v26 = vld [vmem:[#allocation6 + $0x68] sm:$0xff]  ;;  %v108_v29 = vmul.f32 2.0, %v92_v25  ;;  %v101_v35 = vld [vmem:[#allocation6 + $0x70] sm:$0xff]  ;;  %v113_v38 = vmul.f32 2.0, %v97_v34  ;;  %vm349_vm2 = vcmp.eq.s32.totalorder %v1315_v51, %v1066_v52  ;;  %v1074_v60 = vadd.s32 4294967288, %v57_v54 }
  0x14   :  { %218 = vmatpush.xpose.msra.mxu0 %v213_v2  ;;  %1084 = vmatpush.xpose.msra.mxu1 %v213_v2  ;;  %v95_v19 = vld [vmem:[#allocation6 + $0x40] sm:$0xff]  ;;  %v115_v22 = vmul.f32 2.0, %v99_v18  ;;  %v96_v27 = vld [vmem:[#allocation6 + $0x48] sm:$0xff]  ;;  %v116_v30 = vmul.f32 2.0, %v100_v26  ;;  %v117_v39 = vmul.f32 2.0, %v101_v35  ;;  %v90_v40 = vld [vmem:[#allocation6 + $0x18] sm:$0xff]  ;;  %vm470_vm6 = vcmp.ne.s32.totalorder %v57_v54, %v1315_v51 }
  0x15   :  { %1086 = vmatpush.xpose.msra.mxu3 %v213_v2  ;;  %1085 = vmatpush.xpose.msra.mxu2 %v213_v2  ;;  %v111_v23 = vmul.f32 2.0, %v95_v19  ;;  %v112_v31 = vmul.f32 2.0, %v96_v27  ;;  %v94_v41 = vld [vmem:[#allocation6 + $0x38] sm:$0xff]  ;;  %v106_v44 = vmul.f32 2.0, %v90_v40  ;;  %vm477_vm3 = vmand %vm458_vm0, %vm474_vm1  ;;  %vm357_vm9 = vcmp.eq.s32.totalorder %v1315_v51, %v1074_v60 }
  0x16   :  { %v102_v42 = vld [vmem:[#allocation6 + $0x78] sm:$0xff]  ;;  %v110_v45 = vmul.f32 2.0, %v94_v41  ;;  %vm481_vm7 = vmand %vm462_vm5, %vm474_vm1  ;;  %vm466_vm10 = vcmp.ne.s32.totalorder %v53_v61, %v1315_v51  ;;  %v56_v54 = vadd.s32 88, %v1312_v49 }
  0x17   :  { %v98_v43 = vld [vmem:[#allocation6 + $0x58] sm:$0xff]  ;;  %v118_v46 = vmul.f32 2.0, %v102_v42  ;;  %vm489_vm8 = vmand %vm470_vm6, %vm474_vm1 }
  0x18   :  { %219 = vmatpush.xpose.msra.mxu0 %v212_v3  ;;  %1087 = vmatpush.xpose.msra.mxu1 %v212_v3  ;;  %v114_v47 = vmul.f32 2.0, %v98_v43  ;;  %vm485_vm13 = vmand %vm466_vm10, %vm474_vm1 }
  0x19   :  { %1089 = vmatpush.xpose.msra.mxu3 %v212_v3  ;;  %1088 = vmatpush.xpose.msra.mxu2 %v212_v3  ;;  %v1070_v3 = vadd.s32 4294967288, %v53_v61 }
  0x1b   :  { %vm353_vm11 = vcmp.eq.s32.totalorder %v1315_v51, %v1070_v3 }
  0x1c   :  { %220 = vmatpush.xpose.msra.mxu0 %v211_v4  ;;  %1090 = vmatpush.xpose.msra.mxu1 %v211_v4 }
  0x1d   :  { %1092 = vmatpush.xpose.msra.mxu3 %v211_v4  ;;  %1091 = vmatpush.xpose.msra.mxu2 %v211_v4  ;;  %v1075_v4 = vadd.s32 4294967288, %v58_v62 }
  0x1f   :  { %vm358_vm12 = vcmp.eq.s32.totalorder %v1315_v51, %v1075_v4 }
  0x20   :  { %221 = vmatpush.xpose.msra.mxu0 %v210_v5  ;;  %1093 = vmatpush.xpose.msra.mxu1 %v210_v5 }
  0x21   :  { %1095 = vmatpush.xpose.msra.mxu3 %v210_v5  ;;  %1094 = vmatpush.xpose.msra.mxu2 %v210_v5 }
  0x24   :  { %222 = vmatpush.xpose.msra.mxu0 %v209_v6  ;;  %1096 = vmatpush.xpose.msra.mxu1 %v209_v6 }
  0x25   :  { %1098 = vmatpush.xpose.msra.mxu3 %v209_v6  ;;  %1097 = vmatpush.xpose.msra.mxu2 %v209_v6  ;;  %v50_v6 = vadd.s32 40, %v1312_v49 }
  0x28   :  { %223 = vmatpush.xpose.msra.mxu0 %v208_v7  ;;  %1099 = vmatpush.xpose.msra.mxu1 %v208_v7 }
  0x29   :  { %1101 = vmatpush.xpose.msra.mxu3 %v208_v7  ;;  %1100 = vmatpush.xpose.msra.mxu2 %v208_v7  ;;  %v54_v7 = vadd.s32 72, %v1312_v49 }
  0x2b   :  { %vm467_vm14 = vcmp.ne.s32.totalorder %v54_v7, %v1315_v51  ;;  %v1071_v27 = vadd.s32 4294967288, %v54_v7 }
  0x2c   :  { %224 = vmatpush.xpose.msra.mxu0 %v207_v8  ;;  %1102 = vmatpush.xpose.msra.mxu1 %v207_v8  ;;  %vm486_vm0 = vmand %vm467_vm14, %vm474_vm1 }
  0x2d   :  { %1104 = vmatpush.xpose.msra.mxu3 %v207_v8  ;;  %1103 = vmatpush.xpose.msra.mxu2 %v207_v8 }
  0x30   :  { %225 = vmatpush.xpose.msra.mxu0 %v206_v9  ;;  %1105 = vmatpush.xpose.msra.mxu1 %v206_v9 }
  0x31   :  { %1107 = vmatpush.xpose.msra.mxu3 %v206_v9  ;;  %1106 = vmatpush.xpose.msra.mxu2 %v206_v9 }
  0x34   :  { %226 = vmatpush.xpose.msra.mxu0 %v205_v10  ;;  %1108 = vmatpush.xpose.msra.mxu1 %v205_v10 }
  0x35   :  { %1110 = vmatpush.xpose.msra.mxu3 %v205_v10  ;;  %1109 = vmatpush.xpose.msra.mxu2 %v205_v10 }
  0x38   :  { %227 = vmatpush.xpose.msra.mxu0 %v204_v11  ;;  %1111 = vmatpush.xpose.msra.mxu1 %v204_v11 }
  0x39   :  { %1113 = vmatpush.xpose.msra.mxu3 %v204_v11  ;;  %1112 = vmatpush.xpose.msra.mxu2 %v204_v11 }
  0x3c   :  { %228 = vmatpush.xpose.msra.mxu0 %v203_v12  ;;  %1114 = vmatpush.xpose.msra.mxu1 %v203_v12 }
  0x3d   :  { %1116 = vmatpush.xpose.msra.mxu3 %v203_v12  ;;  %1115 = vmatpush.xpose.msra.mxu2 %v203_v12  ;;  %v1067_v12 = vadd.s32 4294967288, %v50_v6 }
  0x3f   :  { %vm350_vm15 = vcmp.eq.s32.totalorder %v1315_v51, %v1067_v12 }
  0x40   :  { %229 = vmatpush.xpose.msra.mxu0 %v202_v13  ;;  %1117 = vmatpush.xpose.msra.mxu1 %v202_v13 }
  0x41   :  { %1119 = vmatpush.xpose.msra.mxu3 %v202_v13  ;;  %1118 = vmatpush.xpose.msra.mxu2 %v202_v13  ;;  %v1063_v13 = vadd.s32 4294967288, %v1318_v53 }
  0x44   :  { %230 = vmatpush.xpose.msra.mxu0 %v201_v14  ;;  %1120 = vmatpush.xpose.msra.mxu1 %v201_v14 }
  0x45   :  { %1122 = vmatpush.xpose.msra.mxu3 %v201_v14  ;;  %1121 = vmatpush.xpose.msra.mxu2 %v201_v14 }
  0x48   :  { %231 = vmatpush.xpose.msra.mxu0 %v200_v17  ;;  %1123 = vmatpush.xpose.msra.mxu1 %v200_v17 }
  0x49   :  { %1125 = vmatpush.xpose.msra.mxu3 %v200_v17  ;;  %1124 = vmatpush.xpose.msra.mxu2 %v200_v17  ;;  %v47_v17 = vadd.s32 16, %v1312_v49 }
  0x4b   :  { %232 = vmatmul.f32.vlgmr.msra.gmra.mxu0 %v103_v20  ;;  %244 = vmatmul.f32.vlgmr.msra.gmra.mxu1 %v107_v21  ;;  %v1064_v21 = vadd.s32 4294967288, %v47_v17 }
  0x4c   :  { %268 = vmatmul.f32.vlgmr.msra.gmra.mxu3 %v115_v22  ;;  %256 = vmatmul.f32.vlgmr.msra.gmra.mxu2 %v111_v23  ;;  %v51_v23 = vadd.s32 48, %v1312_v49 }
  0x4d   :  { %vm347_vm5 = vcmp.eq.s32.totalorder %v1315_v51, %v1064_v21 }
  0x53   :  { %235 = vmatmul.f32.gmra.mxu0 %v104_v28  ;;  %247 = vmatmul.f32.gmra.mxu1 %v108_v29  ;;  %v55_v29 = vadd.s32 80, %v1312_v49 }
  0x54   :  { %271 = vmatmul.f32.gmra.mxu3 %v116_v30  ;;  %259 = vmatmul.f32.gmra.mxu2 %v112_v31  ;;  %v59_v30 = vadd.s32 112, %v1312_v49 }
  0x55   :  { %v1072_v34 = vadd.s32 4294967288, %v55_v29 }
  0x56   :  { %v1076_v35 = vadd.s32 4294967288, %v59_v30 }
  0x58   :  { %vm359_vm14 = vcmp.eq.s32.totalorder %v1315_v51, %v1076_v35 }
  0x5b   :  { %238 = vmatmul.f32.gmra.mxu0 %v105_v36  ;;  %250 = vmatmul.f32.gmra.mxu1 %v109_v37  ;;  %v1068_v36 = vadd.s32 4294967288, %v51_v23 }
  0x5c   :  { %262 = vmatmul.f32.gmra.mxu2 %v113_v38  ;;  %274 = vmatmul.f32.gmra.mxu3 %v117_v39  ;;  %v48_v39 = vadd.s32 24, %v1312_v49 }
  0x5e   :  { %v1065_v43 = vadd.s32 4294967288, %v48_v39 }
  0x63   :  { %241 = vmatmul.f32.gmra.mxu0 %v106_v44  ;;  %253 = vmatmul.f32.gmra.mxu1 %v110_v45  ;;  %v52_v45 = vadd.s32 56, %v1312_v49 }
  0x64   :  { %277 = vmatmul.f32.gmra.mxu3 %v118_v46  ;;  %265 = vmatmul.f32.gmra.mxu2 %v114_v47  ;;  %v1288_v46 = vmov 0.0  }
  0x65   :  { %v1069_v52 = vadd.s32 4294967288, %v52_v45 }
  0xc8   :  { %v233_v55 = vpop.f32.mrf.mxu0  ;;  %v245_v56 = vpop.f32.mrf.mxu1 }
  0xc9   :  { %v381_v57 = vsel %vm349_vm2, %v245_v56, 0.0  ;;  %v1330_v58 = vsel %vm477_vm3, %v233_v55, -inf  ;;  %v377_v59 = vsel %vm345_vm4, %v233_v55, 0.0  ;;  %v1341_v0 = vsel %vm481_vm7, %v245_v56, -inf }
  0xca   :  { %401 = vadd.xlane.f32.xlu2 %v381_v57  ;;  %525 = vmax.xlane.f32.xlu1 %v1330_v58  ;;  %vm346_vm2 = vcmp.eq.s32.totalorder %v1315_v51, %v1063_v13  ;;  %vm463_vm3 = vcmp.ne.s32.totalorder %v50_v6, %v1315_v51  ;;  %vm459_vm4 = vcmp.ne.s32.totalorder %v1318_v53, %v1315_v51  ;;  %v60_v55 = vadd.s32 120, %v1312_v49 }
  0xcb   :  { %393 = vadd.xlane.f32.xlu0 %v377_v59  ;;  %vm482_vm6 = vmand %vm463_vm3, %vm474_vm1  ;;  %vm135_vm3 = vcmask 7168   ;;  %v1073_v59 = vadd.s32 4294967288, %v56_v54  ;;  %v1290_v6 = vmov 0  }
  0xcc   :  { %vm478_vm7 = vmand %vm459_vm4, %vm474_vm1  ;;  %vm348_vm4 = vcmp.eq.s32.totalorder %v1315_v51, %v1065_v43  ;;  %172 = vst.msk [vmem:[#allocation5 + $0x20] sm:$0xff] %vm135_vm3, %v1288_v46  ;;  %v1077_v49 = vadd.s32 4294967288, %v60_v55  ;;  %1133 = vset.pattern.permute.xlu2 %v1290_v6  ;;  %1134 = vset.pattern.permute.xlu0 %v1290_v6 }
  0xcd   :  { %152 = vst.msk [vmem:[#allocation4] sm:$0xff] %vm135_vm3, %v1288_v46  ;;  %1135 = vset.pattern.permute.xlu1 %v1290_v6 }
  0xce   :  { %153 = vst.msk [vmem:[#allocation4 + $0x8] sm:$0xff] %vm135_vm3, %v1288_v46 }
  0xcf   :  { %v269_v63 = vpop.f32.mrf.mxu3  ;;  %v257_v5 = vpop.f32.mrf.mxu2  ;;  %154 = vst.msk [vmem:[#allocation4 + $0x10] sm:$0xff] %vm135_vm3, %v1288_v46 }
  0xd0   :  { %v1343_v1 = vsel %vm489_vm8, %v269_v63, -inf  ;;  %v389_v2 = vsel %vm357_vm9, %v269_v63, 0.0  ;;  %v385_v9 = vsel %vm353_vm11, %v257_v5, 0.0  ;;  %v1354_v11 = vsel %vm485_vm13, %v257_v5, -inf  ;;  %v236_v14 = vpop.f32.mrf.mxu0  ;;  %v248_v15 = vpop.f32.mrf.mxu1  ;;  %155 = vst.msk [vmem:[#allocation4 + $0x18] sm:$0xff] %vm135_vm3, %v1288_v46 }
  0xd1   :  { %v382_v18 = vsel %vm350_vm15, %v248_v15, 0.0  ;;  %v378_v20 = vsel %vm346_vm2, %v236_v14, 0.0  ;;  %v1376_v25 = vsel %vm482_vm6, %v248_v15, -inf  ;;  %vm471_vm8 = vcmp.ne.s32.totalorder %v58_v62, %v1315_v51  ;;  %156 = vst.msk [vmem:[#allocation4 + $0x20] sm:$0xff] %vm135_vm3, %v1288_v46 }
  0xd2   :  { %533 = vmax.xlane.f32.xlu2 %v1341_v0  ;;  %549 = vmax.xlane.f32.xlu1 %v1343_v1  ;;  %v1379_v26 = vsel %vm478_vm7, %v236_v14, -inf  ;;  %vm464_vm9 = vcmp.ne.s32.totalorder %v51_v23, %v1315_v51  ;;  %vm490_vm10 = vmand %vm471_vm8, %vm474_vm1  ;;  %vm355_vm13 = vcmp.eq.s32.totalorder %v1315_v51, %v1072_v34  ;;  %vm351_vm15 = vcmp.eq.s32.totalorder %v1315_v51, %v1068_v36 }
  0xd3   :  { %417 = vadd.xlane.f32.xlu0 %v389_v2  ;;  %vm483_vm11 = vmand %vm464_vm9, %vm474_vm1  ;;  %vm460_vm2 = vcmp.ne.s32.totalorder %v47_v17, %v1315_v51  ;;  %vm465_vm7 = vcmp.ne.s32.totalorder %v52_v45, %v1315_v51  ;;  %157 = vst.msk [vmem:[#allocation4 + $0x28] sm:$0xff] %vm135_vm3, %v1288_v46  ;;  %vm472_vm8 = vcmp.ne.s32.totalorder %v59_v30, %v1315_v51  ;;  %v365_v7 = vld [vmem:[#allocation5 + $0x20] sm:$0xff] }
  0xd4   :  { %vm479_vm6 = vmand %vm460_vm2, %vm474_vm1  ;;  %158 = vst.msk [vmem:[#allocation4 + $0x30] sm:$0xff] %vm135_vm3, %v1288_v46  ;;  %vm352_vm9 = vcmp.eq.s32.totalorder %v1315_v51, %v1069_v52  ;;  %vm473_vm2 = vcmp.ne.s32.totalorder %v60_v55, %v1315_v51 }
  0xd5   :  { %159 = vst.msk [vmem:[#allocation4 + $0x38] sm:$0xff] %vm135_vm3, %v1288_v46 }
  0xd6   :  { %160 = vst.msk [vmem:[#allocation4 + $0x40] sm:$0xff] %vm135_vm3, %v1288_v46 }
  0xd7   :  { %v272_v8 = vpop.f32.mrf.mxu3  ;;  %v260_v16 = vpop.f32.mrf.mxu2  ;;  %161 = vst.msk [vmem:[#allocation4 + $0x48] sm:$0xff] %vm135_vm3, %v1288_v46 }
  0xd8   :  { %v390_v10 = vsel %vm358_vm12, %v272_v8, 0.0  ;;  %v1364_v19 = vsel %vm486_vm0, %v260_v16, -inf  ;;  %v239_v22 = vpop.f32.mrf.mxu0  ;;  %v251_v28 = vpop.f32.mrf.mxu1  ;;  %vm354_vm12 = vcmp.eq.s32.totalorder %v1315_v51, %v1071_v27  ;;  %v1391_v31 = vsel %vm490_vm10, %v272_v8, -inf  ;;  %vm484_vm10 = vmand %vm465_vm7, %vm474_vm1  ;;  %162 = vst.msk [vmem:[#allocation4 + $0x50] sm:$0xff] %vm135_vm3, %v1288_v46 }
  0xd9   :  { %v379_v24 = vsel %vm347_vm5, %v239_v22, 0.0  ;;  %v1393_v32 = vsel %vm483_vm11, %v251_v28, -inf  ;;  %v386_v33 = vsel %vm354_vm12, %v260_v16, 0.0  ;;  %v383_v42 = vsel %vm351_vm15, %v251_v28, 0.0  ;;  %vm491_vm11 = vmand %vm472_vm8, %vm474_vm1  ;;  %163 = vst.msk [vmem:[#allocation4 + $0x58] sm:$0xff] %vm135_vm3, %v1288_v46 }
  0xda   :  { %409 = vadd.xlane.f32.xlu2 %v385_v9  ;;  %419 = vadd.xlane.f32.xlu1 %v390_v10  ;;  %vm468_vm0 = vcmp.ne.s32.totalorder %v55_v29, %v1315_v51  ;;  %v1419_v50 = vsel %vm479_vm6, %v239_v22, -inf  ;;  %vm461_vm12 = vcmp.ne.s32.totalorder %v48_v39, %v1315_v51  ;;  %164 = vst.msk [vmem:[#allocation4 + $0x60] sm:$0xff] %vm135_vm3, %v1288_v46 }
  0xdb   :  { %541 = vmax.xlane.f32.xlu0 %v1354_v11  ;;  %vm487_vm5 = vmand %vm468_vm0, %vm474_vm1  ;;  %165 = vst.msk [vmem:[#allocation4 + $0x68] sm:$0xff] %vm135_vm3, %v1288_v46  ;;  %vm360_vm15 = vcmp.eq.s32.totalorder %v1315_v51, %v1077_v49  ;;  %vm469_vm0 = vcmp.ne.s32.totalorder %v56_v54, %v1315_v51 }
  0xdc   :  { %166 = vst.msk [vmem:[#allocation4 + $0x70] sm:$0xff] %vm135_vm3, %v1288_v46 }
  0xdd   :  { %167 = vst.msk [vmem:[#allocation4 + $0x78] sm:$0xff] %vm135_vm3, %v1288_v46 }
  0xde   :  { %168 = vst.msk [vmem:[#allocation5] sm:$0xff] %vm135_vm3, %v1288_v46 }
  0xdf   :  { %v263_v37 = vpop.f32.mrf.mxu2  ;;  %v275_v38 = vpop.f32.mrf.mxu3  ;;  %169 = vst.msk [vmem:[#allocation5 + $0x8] sm:$0xff] %vm135_vm3, %v1288_v46 }
  0xe0   :  { %v387_v40 = vsel %vm355_vm13, %v263_v37, 0.0  ;;  %v391_v41 = vsel %vm359_vm14, %v275_v38, 0.0  ;;  %v242_v44 = vpop.f32.mrf.mxu0  ;;  %v1415_v48 = vsel %vm487_vm5, %v263_v37, -inf  ;;  %v254_v53 = vpop.f32.mrf.mxu1  ;;  %v1455_v60 = vsel %vm491_vm11, %v275_v38, -inf  ;;  %vm480_vm13 = vmand %vm461_vm12, %vm474_vm1  ;;  %170 = vst.msk [vmem:[#allocation5 + $0x10] sm:$0xff] %vm135_vm3, %v1288_v46 }
  0xe1   :  { %v380_v47 = vsel %vm348_vm4, %v242_v44, 0.0  ;;  %v384_v56 = vsel %vm352_vm9, %v254_v53, 0.0  ;;  %v1446_v57 = vsel %vm484_vm10, %v254_v53, -inf  ;;  %vm356_vm14 = vcmp.eq.s32.totalorder %v1315_v51, %v1073_v59  ;;  %171 = vst.msk [vmem:[#allocation5 + $0x18] sm:$0xff] %vm135_vm3, %v1288_v46  ;;  %vm488_vm4 = vmand %vm469_vm0, %vm474_vm1 }
  0xe2   :  { %403 = vadd.xlane.f32.xlu2 %v382_v18  ;;  %543 = vmax.xlane.f32.xlu1 %v1364_v19  ;;  %v1473_v63 = vsel %vm480_vm13, %v242_v44, -inf  ;;  %173 = vst.msk [vmem:[#allocation5 + $0x28] sm:$0xff] %vm135_vm3, %v1288_v46  ;;  %vm492_vm5 = vmand %vm473_vm2, %vm474_vm1  ;;  %v1289_v51 = vmov -inf  }
  0xe3   :  { %395 = vadd.xlane.f32.xlu0 %v378_v20  ;;  %174 = vst.msk [vmem:[#allocation5 + $0x30] sm:$0xff] %vm135_vm3, %v1288_v46 }
  0xe4   :  { %175 = vst.msk [vmem:[#allocation5 + $0x38] sm:$0xff] %vm135_vm3, %v1288_v46 }
  0xe5   :  { %176 = vst.msk [vmem:[#allocation5 + $0x40] sm:$0xff] %vm135_vm3, %v1288_v46  ;;  %v361_v9 = vld [vmem:[#allocation5] sm:$0xff] }
  0xe6   :  { %177 = vst.msk [vmem:[#allocation5 + $0x48] sm:$0xff] %vm135_vm3, %v1288_v46 }
  0xe7   :  { %v266_v61 = vpop.f32.mrf.mxu2  ;;  %v278_v62 = vpop.f32.mrf.mxu3  ;;  %178 = vst.msk [vmem:[#allocation5 + $0x50] sm:$0xff] %vm135_vm3, %v1288_v46 }
  0xe8   :  { %v388_v2 = vsel %vm356_vm14, %v266_v61, 0.0  ;;  %v392_v3 = vsel %vm360_vm15, %v278_v62, 0.0  ;;  %179 = vst.msk [vmem:[#allocation5 + $0x58] sm:$0xff] %vm135_vm3, %v1288_v46  ;;  %v1500_v4 = vsel %vm488_vm4, %v266_v61, -inf  ;;  %v1504_v5 = vsel %vm492_vm5, %v278_v62, -inf  ;;  %v363_v61 = vld [vmem:[#allocation5 + $0x10] sm:$0xff] }
  0xe9   :  { %180 = vst.msk [vmem:[#allocation5 + $0x60] sm:$0xff] %vm135_vm3, %v1288_v46  ;;  %v366_v44 = vld [vmem:[#allocation5 + $0x28] sm:$0xff] }
  0xea   :  { %527 = vmax.xlane.f32.xlu2 %v1379_v26  ;;  %397 = vadd.xlane.f32.xlu1 %v379_v24  ;;  %181 = vst.msk [vmem:[#allocation5 + $0x68] sm:$0xff] %vm135_vm3, %v1288_v46 }
  0xeb   :  { %535 = vmax.xlane.f32.xlu0 %v1376_v25  ;;  %182 = vst.msk [vmem:[#allocation5 + $0x70] sm:$0xff] %vm135_vm3, %v1288_v46 }
  0xec   :  { %183 = vst.msk [vmem:[#allocation5 + $0x78] sm:$0xff] %vm135_vm3, %v1288_v46  ;;  %v369_v34 = vld [vmem:[#allocation5 + $0x40] sm:$0xff]  ;;  %v362_v46 = vld [vmem:[#allocation5 + $0x8] sm:$0xff] }
  0xed   :  { %136 = vst.msk [vmem:[#allocation3] sm:$0xff] %vm135_vm3, %v1289_v51 }
  0xee   :  { %137 = vst.msk [vmem:[#allocation3 + $0x8] sm:$0xff] %vm135_vm3, %v1289_v51 }
  0xef   :  { %138 = vst.msk [vmem:[#allocation3 + $0x10] sm:$0xff] %vm135_vm3, %v1289_v51 }
  0xf0   :  { %139 = vst.msk [vmem:[#allocation3 + $0x18] sm:$0xff] %vm135_vm3, %v1289_v51  ;;  %v373_v21 = vld [vmem:[#allocation5 + $0x60] sm:$0xff] }
  0xf1   :  { %140 = vst.msk [vmem:[#allocation3 + $0x20] sm:$0xff] %vm135_vm3, %v1289_v51  ;;  %v374_v35 = vld [vmem:[#allocation5 + $0x68] sm:$0xff] }
  0xf2   :  { %551 = vmax.xlane.f32.xlu2 %v1391_v31  ;;  %537 = vmax.xlane.f32.xlu1 %v1393_v32  ;;  %141 = vst.msk [vmem:[#allocation3 + $0x28] sm:$0xff] %vm135_vm3, %v1289_v51 }
  0xf3   :  { %411 = vadd.xlane.f32.xlu0 %v386_v33  ;;  %142 = vst.msk [vmem:[#allocation3 + $0x30] sm:$0xff] %vm135_vm3, %v1289_v51 }
  0xf4   :  { %143 = vst.msk [vmem:[#allocation3 + $0x38] sm:$0xff] %vm135_vm3, %v1289_v51  ;;  %v1530_v8 = vld [vmem:[#allocation3] sm:$0xff] }
  0xf5   :  { %144 = vst.msk [vmem:[#allocation3 + $0x40] sm:$0xff] %vm135_vm3, %v1289_v51  ;;  %v1587_v49 = vld [vmem:[#allocation3 + $0x8] sm:$0xff] }
  0xf6   :  { %145 = vst.msk [vmem:[#allocation3 + $0x48] sm:$0xff] %vm135_vm3, %v1289_v51 }
  0xf7   :  { %146 = vst.msk [vmem:[#allocation3 + $0x50] sm:$0xff] %vm135_vm3, %v1289_v51 }
  0xf8   :  { %147 = vst.msk [vmem:[#allocation3 + $0x58] sm:$0xff] %vm135_vm3, %v1289_v51  ;;  %v1542_v18 = vld [vmem:[#allocation3 + $0x20] sm:$0xff] }
  0xf9   :  { %148 = vst.msk [vmem:[#allocation3 + $0x60] sm:$0xff] %vm135_vm3, %v1289_v51  ;;  %v1589_v62 = vld [vmem:[#allocation3 + $0x28] sm:$0xff] }
  0xfa   :  { %413 = vadd.xlane.f32.xlu1 %v387_v40  ;;  %421 = vadd.xlane.f32.xlu2 %v391_v41  ;;  %149 = vst.msk [vmem:[#allocation3 + $0x68] sm:$0xff] %vm135_vm3, %v1289_v51 }
  0xfb   :  { %405 = vadd.xlane.f32.xlu0 %v383_v42  ;;  %150 = vst.msk [vmem:[#allocation3 + $0x70] sm:$0xff] %vm135_vm3, %v1289_v51 }
  0xfc   :  { %151 = vst.msk [vmem:[#allocation3 + $0x78] sm:$0xff] %vm135_vm3, %v1289_v51  ;;  %v1562_v36 = vld [vmem:[#allocation3 + $0x40] sm:$0xff] }
  0xfd   :  { %v1575_v45 = vld [vmem:[#allocation3 + $0x48] sm:$0xff] }
 0x100   :  { %v1544_v20 = vld [vmem:[#allocation3 + $0x60] sm:$0xff] }
 0x102   :  { %399 = vadd.xlane.f32.xlu1 %v380_v47  ;;  %545 = vmax.xlane.f32.xlu2 %v1415_v48 }
 0x103   :  { %529 = vmax.xlane.f32.xlu0 %v1419_v50 }
 0x10a   :  { %407 = vadd.xlane.f32.xlu1 %v384_v56  ;;  %539 = vmax.xlane.f32.xlu2 %v1446_v57 }
 0x10b   :  { %553 = vmax.xlane.f32.xlu0 %v1455_v60 }
 0x112   :  { %531 = vmax.xlane.f32.xlu1 %v1473_v63  ;;  %415 = vadd.xlane.f32.xlu2 %v388_v2 }
 0x113   :  { %423 = vadd.xlane.f32.xlu0 %v392_v3 }
 0x11a   :  { %555 = vmax.xlane.f32.xlu1 %v1504_v5 }
 0x11b   :  { %547 = vmax.xlane.f32.xlu0 %v1500_v4 }
 0x13d   :  { %v402_v10 = vpop.xlane.xlu2 %401  ;;  %v526_v12 = vpop.xlane.xlu1 %525 }
 0x13e   :  { %v429_v13 = vadd.f32 %v402_v10, %v365_v7  ;;  %v1533_v14 = vmax.f32 %v1530_v8, %v526_v12  ;;  %v394_v15 = vpop.xlane.xlu0 %393  ;;  %v1686_v10 = vld [vmem:[#allocation3 + $0x78] sm:$0xff] }
 0x13f   :  { %v425_v16 = vadd.f32 %v394_v15, %v361_v9  ;;  %v1610_v15 = vld [vmem:[#allocation3 + $0x30] sm:$0xff] }
 0x140   :  { %446 = vst.msk [vmem:[#allocation5 + $0x20] sm:$0xff] %vm135_vm3, %v429_v13  ;;  %655 = vperm.xlu2 %1133, %v1533_v14   ;;  %v1608_v13 = vld [vmem:[#allocation3 + $0x68] sm:$0xff] }
 0x141   :  { %845 = vst.msk [vmem:[#allocation3] sm:$0xff] %vm135_vm3, %v1533_v14 }
 0x142   :  { %442 = vst.msk [vmem:[#allocation5] sm:$0xff] %vm135_vm3, %v425_v16  ;;  %v370_v16 = vld [vmem:[#allocation5 + $0x48] sm:$0xff] }
 0x145   :  { %v534_v22 = vpop.xlane.xlu2 %533  ;;  %v550_v23 = vpop.xlane.xlu1 %549 }
 0x146   :  { %v1547_v24 = vmax.f32 %v1542_v18, %v534_v22  ;;  %v1550_v27 = vmax.f32 %v1544_v20, %v550_v23  ;;  %v418_v28 = vpop.xlane.xlu0 %417 }
 0x147   :  { %v437_v29 = vadd.f32 %v418_v28, %v373_v21 }
 0x148   :  { %v593_v30 = vsub.f32 %v1542_v18, %v1547_v24  ;;  %849 = vst.msk [vmem:[#allocation3 + $0x20] sm:$0xff] %vm135_vm3, %v1547_v24  ;;  %v601_v33 = vsub.f32 %v1544_v20, %v1550_v27  ;;  %675 = vperm.xlu2 %1133, %v1547_v24   ;;  %v585_v18 = vld [vmem:[#allocation4 + $0x60] sm:$0xff] }
 0x149   :  { %857 = vst.msk [vmem:[#allocation3 + $0x60] sm:$0xff] %vm135_vm3, %v1550_v27 }
 0x14a   :  { %454 = vst.msk [vmem:[#allocation5 + $0x60] sm:$0xff] %vm135_vm3, %v437_v29 }
 0x14d   :  { %v410_v37 = vpop.xlane.xlu2 %409  ;;  %v420_v38 = vpop.xlane.xlu1 %419 }
 0x14e   :  { %v433_v39 = vadd.f32 %v410_v37, %v369_v34  ;;  %v438_v40 = vadd.f32 %v420_v38, %v374_v35  ;;  %v542_v41 = vpop.xlane.xlu0 %541  ;;  %v371_v38 = vld [vmem:[#allocation5 + $0x50] sm:$0xff] }
 0x14f   :  { %v1565_v42 = vmax.f32 %v1562_v36, %v542_v41 }
 0x150   :  { %450 = vst.msk [vmem:[#allocation5 + $0x40] sm:$0xff] %vm135_vm3, %v433_v39  ;;  %715 = vperm.xlu2 %1133, %v1550_v27   ;;  %v375_v39 = vld [vmem:[#allocation5 + $0x70] sm:$0xff] }
 0x151   :  { %455 = vst.msk [vmem:[#allocation5 + $0x68] sm:$0xff] %vm135_vm3, %v438_v40  ;;  %695 = vperm.xlu0 %1134, %v1565_v42   ;;  %v367_v40 = vld [vmem:[#allocation5 + $0x30] sm:$0xff]  ;;  %v1857_v20 = vsub.f32 %v1562_v36, %v1565_v42 }
 0x152   :  { %853 = vst.msk [vmem:[#allocation3 + $0x40] sm:$0xff] %vm135_vm3, %v1565_v42 }
 0x153   :  { %v621_v27 = vmul.f32 1.442695, %v1857_v20 }
 0x155   :  { %v404_v47 = vpop.xlane.xlu2 %403  ;;  %v544_v52 = vpop.xlane.xlu1 %543 }
 0x156   :  { %v430_v53 = vadd.f32 %v404_v47, %v366_v44  ;;  %v1578_v54 = vmax.f32 %v1575_v45, %v544_v52  ;;  %v396_v55 = vpop.xlane.xlu0 %395 }
 0x157   :  { %v426_v56 = vadd.f32 %v396_v55, %v362_v46  ;;  %v364_v55 = vld [vmem:[#allocation5 + $0x18] sm:$0xff] }
 0x158   :  { %447 = vst.msk [vmem:[#allocation5 + $0x28] sm:$0xff] %vm135_vm3, %v430_v53  ;;  %700 = vperm.xlu2 %1133, %v1578_v54  }
 0x159   :  { %854 = vst.msk [vmem:[#allocation3 + $0x48] sm:$0xff] %vm135_vm3, %v1578_v54 }
 0x15a   :  { %443 = vst.msk [vmem:[#allocation5 + $0x8] sm:$0xff] %vm135_vm3, %v426_v56  ;;  %v1632_v56 = vld [vmem:[#allocation3 + $0x50] sm:$0xff] }
 0x15d   :  { %v528_v2 = vpop.xlane.xlu2 %527  ;;  %v398_v3 = vpop.xlane.xlu1 %397 }
 0x15e   :  { %v1592_v51 = vmax.f32 %v1587_v49, %v528_v2  ;;  %v536_v6 = vpop.xlane.xlu0 %535  ;;  %v427_v7 = vadd.f32 %v398_v3, %v363_v61  ;;  %v1634_v61 = vld [vmem:[#allocation3 + $0x10] sm:$0xff] }
 0x15f   :  { %v1595_v9 = vmax.f32 %v1589_v62, %v536_v6 }
 0x160   :  { %846 = vst.msk [vmem:[#allocation3 + $0x8] sm:$0xff] %vm135_vm3, %v1592_v51  ;;  %660 = vperm.xlu0 %1134, %v1592_v51  }
 0x161   :  { %850 = vst.msk [vmem:[#allocation3 + $0x28] sm:$0xff] %vm135_vm3, %v1595_v9  ;;  %680 = vperm.xlu1 %1135, %v1595_v9  }
 0x162   :  { %444 = vst.msk [vmem:[#allocation5 + $0x10] sm:$0xff] %vm135_vm3, %v427_v7 }
 0x165   :  { %v552_v21 = vpop.xlane.xlu2 %551  ;;  %v538_v22 = vpop.xlane.xlu1 %537 }
 0x166   :  { %v1613_v23 = vmax.f32 %v1608_v13, %v552_v21  ;;  %v412_v28 = vpop.xlane.xlu0 %411  ;;  %v1616_v29 = vmax.f32 %v1610_v15, %v538_v22 }
 0x167   :  { %v434_v34 = vadd.f32 %v412_v28, %v370_v16 }
 0x168   :  { %858 = vst.msk [vmem:[#allocation3 + $0x68] sm:$0xff] %vm135_vm3, %v1613_v23  ;;  %685 = vperm.xlu2 %1133, %v1616_v29  }
 0x169   :  { %451 = vst.msk [vmem:[#allocation5 + $0x48] sm:$0xff] %vm135_vm3, %v434_v34  ;;  %720 = vperm.xlu1 %1135, %v1613_v23   ;;  %v368_v34 = vld [vmem:[#allocation5 + $0x38] sm:$0xff] }
 0x16a   :  { %851 = vst.msk [vmem:[#allocation3 + $0x30] sm:$0xff] %vm135_vm3, %v1616_v29 }
 0x16d   :  { %v414_v41 = vpop.xlane.xlu1 %413  ;;  %v422_v44 = vpop.xlane.xlu2 %421 }
 0x16e   :  { %v406_v46 = vpop.xlane.xlu0 %405  ;;  %v435_v47 = vadd.f32 %v414_v41, %v371_v38  ;;  %v439_v52 = vadd.f32 %v422_v44, %v375_v39  ;;  %v1652_v38 = vld [vmem:[#allocation3 + $0x38] sm:$0xff]  ;;  %v1654_v39 = vld [vmem:[#allocation3 + $0x70] sm:$0xff] }
 0x16f   :  { %v431_v53 = vadd.f32 %v406_v46, %v367_v40 }
 0x170   :  { %452 = vst.msk [vmem:[#allocation5 + $0x50] sm:$0xff] %vm135_vm3, %v435_v47 }
 0x171   :  { %448 = vst.msk [vmem:[#allocation5 + $0x30] sm:$0xff] %vm135_vm3, %v431_v53 }
 0x172   :  { %456 = vst.msk [vmem:[#allocation5 + $0x70] sm:$0xff] %vm135_vm3, %v439_v52 }
 0x175   :  { %v400_v2 = vpop.xlane.xlu1 %399  ;;  %v546_v3 = vpop.xlane.xlu2 %545 }
 0x176   :  { %v530_v6 = vpop.xlane.xlu0 %529  ;;  %v428_v7 = vadd.f32 %v400_v2, %v364_v55  ;;  %v1637_v16 = vmax.f32 %v1632_v56, %v546_v3  ;;  %v1673_v2 = vld [vmem:[#allocation3 + $0x18] sm:$0xff] }
 0x177   :  { %v1640_v21 = vmax.f32 %v1634_v61, %v530_v6  ;;  %v372_v3 = vld [vmem:[#allocation5 + $0x58] sm:$0xff] }
 0x178   :  { %445 = vst.msk [vmem:[#allocation5 + $0x18] sm:$0xff] %vm135_vm3, %v428_v7  ;;  %v376_v6 = vld [vmem:[#allocation5 + $0x78] sm:$0xff] }
 0x179   :  { %847 = vst.msk [vmem:[#allocation3 + $0x10] sm:$0xff] %vm135_vm3, %v1640_v21  ;;  %665 = vperm.xlu1 %1135, %v1640_v21  }
 0x17a   :  { %855 = vst.msk [vmem:[#allocation3 + $0x50] sm:$0xff] %vm135_vm3, %v1637_v16 }
 0x17d   :  { %v408_v40 = vpop.xlane.xlu1 %407  ;;  %v540_v41 = vpop.xlane.xlu2 %539 }
 0x17e   :  { %v554_v44 = vpop.xlane.xlu0 %553  ;;  %v432_v46 = vadd.f32 %v408_v40, %v368_v34  ;;  %v1657_v47 = vmax.f32 %v1652_v38, %v540_v41 }
 0x17f   :  { %v1660_v52 = vmax.f32 %v1654_v39, %v554_v44 }
 0x180   :  { %449 = vst.msk [vmem:[#allocation5 + $0x38] sm:$0xff] %vm135_vm3, %v432_v46 }
 0x181   :  { %859 = vst.msk [vmem:[#allocation3 + $0x70] sm:$0xff] %vm135_vm3, %v1660_v52  ;;  %725 = vperm.xlu0 %1134, %v1660_v52   ;;  %705 = vperm.xlu1 %1135, %v1637_v16  }
 0x182   :  { %852 = vst.msk [vmem:[#allocation3 + $0x38] sm:$0xff] %vm135_vm3, %v1657_v47 }
 0x185   :  { %v532_v7 = vpop.xlane.xlu1 %531  ;;  %v416_v34 = vpop.xlane.xlu2 %415 }
 0x186   :  { %v424_v40 = vpop.xlane.xlu0 %423  ;;  %v1676_v41 = vmax.f32 %v1673_v2, %v532_v7  ;;  %v436_v44 = vadd.f32 %v416_v34, %v372_v3  ;;  %v1688_v7 = vld [vmem:[#allocation3 + $0x58] sm:$0xff] }
 0x187   :  { %v440_v46 = vadd.f32 %v424_v40, %v376_v6 }
 0x188   :  { %848 = vst.msk [vmem:[#allocation3 + $0x18] sm:$0xff] %vm135_vm3, %v1676_v41  ;;  %670 = vperm.xlu2 %1133, %v1676_v41  }
 0x189   :  { %457 = vst.msk [vmem:[#allocation5 + $0x78] sm:$0xff] %vm135_vm3, %v440_v46  ;;  %690 = vperm.xlu1 %1135, %v1657_v47  }
 0x18a   :  { %453 = vst.msk [vmem:[#allocation5 + $0x58] sm:$0xff] %vm135_vm3, %v436_v44 }
 0x18d   :  { %v556_v3 = vpop.xlane.xlu1 %555 }
 0x18e   :  { %v548_v6 = vpop.xlane.xlu0 %547  ;;  %v1691_v34 = vmax.f32 %v1686_v10, %v556_v3 }
 0x18f   :  { %v1694_v40 = vmax.f32 %v1688_v7, %v548_v6 }
 0x190   :  { %860 = vst.msk [vmem:[#allocation3 + $0x78] sm:$0xff] %vm135_vm3, %v1691_v34  ;;  %730 = vperm.xlu2 %1133, %v1691_v34  }
 0x191   :  { %856 = vst.msk [vmem:[#allocation3 + $0x58] sm:$0xff] %vm135_vm3, %v1694_v40  ;;  %710 = vperm.xlu0 %1134, %v1694_v40  }
 0x19a   :  { %v1706_v46 = vpop.permute.xlu2 %655 }
 0x1a2   :  { %v676_v3 = vpop.permute.xlu2 %675 }
 0x1a3   :  { %v737_v6 = vsub.f32 %v1341_v0, %v676_v3 }
 0x1a5   :  { %v757_v22 = vmul.f32 1.442695, %v737_v6 }
 0x1a7   :  { %1136 = vpow2.f32 %v757_v22 }
 0x1aa   :  { %v716_v17 = vpop.permute.xlu2 %715 }
 0x1ab   :  { %v745_v55 = vsub.f32 %v1343_v1, %v716_v17 }
 0x1ad   :  { %v773_v28 = vmul.f32 1.442695, %v745_v55  ;;  %v1137_v35 = vpop.eup %1136 }
 0x1af   :  { %1138 = vpow2.f32 %v773_v28 }
 0x1b2   :  { %v701_v53 = vpop.permute.xlu2 %700 }
 0x1b3   :  { %v742_v44 = vsub.f32 %v1364_v19, %v701_v53 }
 0x1b5   :  { %v767_v12 = vmul.f32 1.442695, %v742_v44  ;;  %v1139_v37 = vpop.eup %1138 }
 0x1b7   :  { %1140 = vpow2.f32 %v767_v12 }
 0x1b9   :  { %789 = vadd.xlane.f32.xlu2 %v1137_v35 }
 0x1bd   :  { %v1141_v1 = vpop.eup %1140 }
 0x1c1   :  { %805 = vadd.xlane.f32.xlu2 %v1139_v37 }
 0x1c2   :  { %v686_v43 = vpop.permute.xlu2 %685 }
 0x1c3   :  { %v696_v59 = vpop.permute.xlu0 %695  ;;  %v739_v0 = vsub.f32 %v1393_v32, %v686_v43 }
 0x1c4   :  { %v741_v3 = vsub.f32 %v1354_v11, %v696_v59 }
 0x1c5   :  { %v761_v6 = vmul.f32 1.442695, %v739_v0 }
 0x1c6   :  { %v765_v22 = vmul.f32 1.442695, %v741_v3 }
 0x1c8   :  { %1142 = vpow2.f32 %v765_v22 }
 0x1c9   :  { %799 = vadd.xlane.f32.xlu2 %v1141_v1  ;;  %1144 = vpow2.f32 %v761_v6 }
 0x1ce   :  { %v1143_v17 = vpop.eup %1142 }
 0x1cf   :  { %797 = vadd.xlane.f32.xlu1 %v1143_v17  ;;  %v1145_v35 = vpop.eup %1144 }
 0x1d1   :  { %793 = vadd.xlane.f32.xlu2 %v1145_v35 }
 0x1d2   :  { %v661_v44 = vpop.permute.xlu0 %660 }
 0x1d3   :  { %v681_v19 = vpop.permute.xlu1 %680 }
 0x1d4   :  { %v738_v37 = vsub.f32 %v1376_v25, %v681_v19 }
 0x1d6   :  { %v759_v12 = vmul.f32 1.442695, %v738_v37 }
 0x1d8   :  { %1146 = vpow2.f32 %v759_v12 }
 0x1db   :  { %v721_v28 = vpop.permute.xlu1 %720 }
 0x1dc   :  { %v746_v32 = vsub.f32 %v1391_v31, %v721_v28 }
 0x1de   :  { %v1147_v43 = vpop.eup %1146  ;;  %v775_v11 = vmul.f32 1.442695, %v746_v32 }
 0x1df   :  { %791 = vadd.xlane.f32.xlu1 %v1147_v43 }
 0x1e0   :  { %1148 = vpow2.f32 %v775_v11 }
 0x1e2   :  { %v671_v59 = vpop.permute.xlu2 %670 }
 0x1e6   :  { %v1149_v53 = vpop.eup %1148 }
 0x1e7   :  { %807 = vadd.xlane.f32.xlu0 %v1149_v53 }
 0x1ea   :  { %v731_v55 = vpop.permute.xlu2 %730 }
 0x1eb   :  { %v748_v0 = vsub.f32 %v1504_v5, %v731_v55  ;;  %v666_v3 = vpop.permute.xlu1 %665  ;;  %v736_v5 = vsub.f32 %v1473_v63, %v671_v59  ;;  %v733_v63 = vsub.f32 %v1330_v58, %v1706_v46  ;;  %v629_v58 = vmul.f32 1.442695, %v601_v33 }
 0x1ec   :  { %v735_v22 = vsub.f32 %v1419_v50, %v666_v3 }
 0x1ed   :  { %v779_v25 = vmul.f32 1.442695, %v748_v0  ;;  %v755_v50 = vmul.f32 1.442695, %v736_v5 }
 0x1ee   :  { %v753_v6 = vmul.f32 1.442695, %v735_v22  ;;  %v734_v22 = vsub.f32 %v1379_v26, %v661_v44  ;;  %v613_v26 = vmul.f32 1.442695, %v593_v30  ;;  %v577_v44 = vld [vmem:[#allocation4 + $0x20] sm:$0xff] }
 0x1ef   :  { %1150 = vpow2.f32 %v779_v25  ;;  %v749_v25 = vmul.f32 1.442695, %v733_v63 }
 0x1f0   :  { %1152 = vpow2.f32 %v753_v6  ;;  %v751_v59 = vmul.f32 1.442695, %v734_v22 }
 0x1f3   :  { %v726_v1 = vpop.permute.xlu0 %725  ;;  %v706_v31 = vpop.permute.xlu1 %705 }
 0x1f4   :  { %v747_v17 = vsub.f32 %v1455_v60, %v726_v1  ;;  %v743_v35 = vsub.f32 %v1415_v48, %v706_v31 }
 0x1f5   :  { %v1151_v19 = vpop.eup %1150 }
 0x1f6   :  { %v1153_v37 = vpop.eup %1152  ;;  %v777_v12 = vmul.f32 1.442695, %v747_v17  ;;  %v769_v28 = vmul.f32 1.442695, %v743_v35  ;;  %811 = vadd.xlane.f32.xlu2 %v1151_v19  ;;  %v1856_v19 = vsub.f32 %v1575_v45, %v1578_v54  ;;  %v582_v54 = vld [vmem:[#allocation4 + $0x48] sm:$0xff] }
 0x1f7   :  { %785 = vadd.xlane.f32.xlu1 %v1153_v37 }
 0x1f8   :  { %1154 = vpow2.f32 %v777_v12  ;;  %v623_v37 = vmul.f32 1.442695, %v1856_v19  ;;  %v1860_v19 = vsub.f32 %v1608_v13, %v1613_v23 }
 0x1f9   :  { %1156 = vpow2.f32 %v769_v28  ;;  %v1858_v28 = vsub.f32 %v1610_v15, %v1616_v29 }
 0x1fa   :  { %1158 = vpow2.f32 %v755_v50 }
 0x1fb   :  { %v691_v43 = vpop.permute.xlu1 %690  ;;  %v617_v5 = vmul.f32 1.442695, %v1858_v28  ;;  %v873_v28 = vld [vmem:[#allocation3 + $0x48] sm:$0xff] }
 0x1fc   :  { %v740_v60 = vsub.f32 %v1446_v57, %v691_v43 }
 0x1fe   :  { %v1155_v32 = vpop.eup %1154  ;;  %v763_v55 = vmul.f32 1.442695, %v740_v60 }
 0x1ff   :  { %v1157_v11 = vpop.eup %1156  ;;  %809 = vadd.xlane.f32.xlu1 %v1155_v32 }
 0x200   :  { %801 = vadd.xlane.f32.xlu0 %v1157_v11  ;;  %v1159_v3 = vpop.eup %1158 }
 0x203   :  { %v711_v48 = vpop.permute.xlu0 %710 }
 0x204   :  { %v744_v53 = vsub.f32 %v1500_v4, %v711_v48 }
 0x206   :  { %v771_v0 = vmul.f32 1.442695, %v744_v53  ;;  %v581_v53 = vld [vmem:[#allocation4 + $0x40] sm:$0xff] }
 0x208   :  { %1160 = vpow2.f32 %v771_v0  ;;  %787 = vadd.xlane.f32.xlu0 %v1159_v3  ;;  %v579_v0 = vld [vmem:[#allocation4 + $0x30] sm:$0xff]  ;;  %v948_v3 = vld [vmem:[#allocation5 + $0x20] sm:$0xff] }
 0x209   :  { %1162 = vpow2.f32 %v763_v55  ;;  %v868_v55 = vld [vmem:[#allocation3 + $0x20] sm:$0xff] }
 0x20a   :  { %1164 = vpow2.f32 %v751_v59 }
 0x20b   :  { %1166 = vpow2.f32 %v749_v25 }
 0x20c   :  { %1168 = vpow2.f32 %v613_v26 }
 0x20d   :  { %1170 = vpow2.f32 %v629_v58 }
 0x20e   :  { %v1161_v6 = vpop.eup %1160  ;;  %1172 = vpow2.f32 %v623_v37  ;;  %v631_v37 = vmul.f32 1.442695, %v1860_v19  ;;  %v588_v19 = vld [vmem:[#allocation4 + $0x78] sm:$0xff] }
 0x20f   :  { %v1163_v1 = vpop.eup %1162  ;;  %803 = vadd.xlane.f32.xlu1 %v1161_v6 }
 0x210   :  { %795 = vadd.xlane.f32.xlu0 %v1163_v1  ;;  %v1165_v57 = vpop.eup %1164  ;;  %v1859_v1 = vsub.f32 %v1589_v62, %v1595_v9  ;;  %v956_v9 = vld [vmem:[#allocation5 + $0x60] sm:$0xff] }
 0x211   :  { %v1167_v4 = vpop.eup %1166 }
 0x212   :  { %v1169_v46 = vpop.eup %1168 }
 0x213   :  { %v641_v31 = vmul.f32 %v1169_v46, %v577_v44  ;;  %v1171_v12 = vpop.eup %1170 }
 0x214   :  { %v649_v24 = vmul.f32 %v1171_v12, %v585_v18  ;;  %v1173_v45 = vpop.eup %1172 }
 0x215   :  { %v646_v32 = vmul.f32 %v1173_v45, %v582_v54 }
 0x217   :  { %783 = vadd.xlane.f32.xlu1 %v1165_v57  ;;  %v615_v57 = vmul.f32 1.442695, %v1859_v1  ;;  %v1861_v1 = vsub.f32 %v1686_v10, %v1691_v34 }
 0x218   :  { %781 = vadd.xlane.f32.xlu0 %v1167_v4 }
 0x22c   :  { %v790_v17 = vpop.xlane.xlu2 %789 }
 0x22d   :  { %v817_v35 = vadd.f32 %v790_v17, %v641_v31  ;;  %v876_v17 = vld [vmem:[#allocation3 + $0x60] sm:$0xff] }
 0x22f   :  { %833 = vst.msk [vmem:[#allocation4 + $0x20] sm:$0xff] %vm135_vm3, %v817_v35 }
 0x234   :  { %v806_v30 = vpop.xlane.xlu2 %805 }
 0x235   :  { %v825_v33 = vadd.f32 %v806_v30, %v649_v24 }
 0x236   :  { %v884_v50 = vld [vmem:[#allocation4 + $0x20] sm:$0xff] }
 0x237   :  { %1174 = vlog2.f32 %v884_v50  ;;  %841 = vst.msk [vmem:[#allocation4 + $0x60] sm:$0xff] %vm135_vm3, %v825_v33  ;;  %v578_v33 = vld [vmem:[#allocation4 + $0x28] sm:$0xff] }
 0x238   :  { %1176 = vpow2.f32 %v621_v27  ;;  %v953_v50 = vld [vmem:[#allocation5 + $0x48] sm:$0xff] }
 0x239   :  { %1178 = vpow2.f32 %v617_v5 }
 0x23c   :  { %v800_v43 = vpop.xlane.xlu2 %799 }
 0x23d   :  { %v1175_v11 = vpop.eup %1174  ;;  %v822_v60 = vadd.f32 %v800_v43, %v646_v32 }
 0x23e   :  { %v1177_v36 = vpop.eup %1176  ;;  %v905_v42 = vmul.f32 0.6931472, %v1175_v11  ;;  %v892_v48 = vld [vmem:[#allocation4 + $0x60] sm:$0xff] }
 0x23f   :  { %1180 = vlog2.f32 %v892_v48  ;;  %838 = vst.msk [vmem:[#allocation4 + $0x48] sm:$0xff] %vm135_vm3, %v822_v60  ;;  %v1179_v15 = vpop.eup %1178  ;;  %v645_v22 = vmul.f32 %v1177_v36, %v581_v53  ;;  %v872_v36 = vld [vmem:[#allocation3 + $0x40] sm:$0xff] }
 0x240   :  { %v932_v29 = vadd.f32 %v905_v42, %v868_v55  ;;  %v643_v6 = vmul.f32 %v1179_v15, %v579_v0  ;;  %v586_v55 = vld [vmem:[#allocation4 + $0x68] sm:$0xff]  ;;  %v952_v15 = vld [vmem:[#allocation5 + $0x40] sm:$0xff] }
 0x242   :  { %v964_v63 = vsub.f32 %v932_v29, %v948_v3  ;;  %v798_v59 = vpop.xlane.xlu1 %797  ;;  %v870_v29 = vld [vmem:[#allocation3 + $0x30] sm:$0xff] }
 0x243   :  { %v821_v25 = vadd.f32 %v798_v59, %v645_v22  ;;  %v950_v22 = vld [vmem:[#allocation5 + $0x30] sm:$0xff] }
 0x244   :  { %v1028_v4 = vmul.f32 0.0, %v964_v63  ;;  %v794_v26 = vpop.xlane.xlu2 %793 }
 0x245   :  { %v1181_v58 = vpop.eup %1180  ;;  %837 = vst.msk [vmem:[#allocation4 + $0x40] sm:$0xff] %vm135_vm3, %v821_v25  ;;  %v819_v46 = vadd.f32 %v794_v26, %v643_v6  ;;  %v1862_v26 = vsub.f32 %v1634_v61, %v1640_v21  ;;  %v1863_v61 = vsub.f32 %v1654_v39, %v1660_v52 }
 0x246   :  { %1044 = vst.msk [vmem:[%s1855_s2 + $0x20] sm:$0xff] %vm135_vm3, %v1028_v4  ;;  %v921_v44 = vmul.f32 0.6931472, %v1181_v58  ;;  %v889_v31 = vld [vmem:[#allocation4 + $0x48] sm:$0xff] }
 0x247   :  { %1182 = vlog2.f32 %v889_v31  ;;  %835 = vst.msk [vmem:[#allocation4 + $0x30] sm:$0xff] %vm135_vm3, %v819_v46  ;;  %v609_v58 = vmul.f32 1.442695, %v1862_v26  ;;  %v633_v21 = vmul.f32 1.442695, %v1863_v61 }
 0x248   :  { %1184 = vpow2.f32 %v615_v57  ;;  %v940_v62 = vadd.f32 %v921_v44, %v876_v17  ;;  %v635_v57 = vmul.f32 1.442695, %v1861_v1 }
 0x24a   :  { %v972_v35 = vsub.f32 %v940_v62, %v956_v9  ;;  %v869_v62 = vld [vmem:[#allocation3 + $0x28] sm:$0xff]  ;;  %v1864_v9 = vsub.f32 %v1632_v56, %v1637_v16 }
 0x24b   :  { %v877_v16 = vld [vmem:[#allocation3 + $0x68] sm:$0xff] }
 0x24c   :  { %v1036_v12 = vmul.f32 0.0, %v972_v35  ;;  %v888_v18 = vld [vmem:[#allocation4 + $0x40] sm:$0xff]  ;;  %v625_v35 = vmul.f32 1.442695, %v1864_v9 }
 0x24d   :  { %v1183_v24 = vpop.eup %1182  ;;  %1186 = vlog2.f32 %v888_v18  ;;  %v575_v18 = vld [vmem:[#allocation4 + $0x10] sm:$0xff] }
 0x24e   :  { %v1185_v20 = vpop.eup %1184  ;;  %1052 = vst.msk [vmem:[%s1855_s2 + $0x60] sm:$0xff] %vm135_vm3, %v1036_v12  ;;  %v915_v27 = vmul.f32 0.6931472, %v1183_v24  ;;  %v886_v30 = vld [vmem:[#allocation4 + $0x30] sm:$0xff]  ;;  %v949_v24 = vld [vmem:[#allocation5 + $0x28] sm:$0xff] }
 0x24f   :  { %1188 = vlog2.f32 %v886_v30  ;;  %v642_v13 = vmul.f32 %v1185_v20, %v578_v33 }
 0x250   :  { %1190 = vpow2.f32 %v631_v37  ;;  %v937_v5 = vadd.f32 %v915_v27, %v873_v28 }
 0x252   :  { %v969_v23 = vsub.f32 %v937_v5, %v953_v50  ;;  %v792_v45 = vpop.xlane.xlu1 %791 }
 0x253   :  { %v1187_v54 = vpop.eup %1186  ;;  %v818_v32 = vadd.f32 %v792_v45, %v642_v13  ;;  %v1865_v13 = vsub.f32 %v1673_v2, %v1676_v41  ;;  %v1866_v2 = vsub.f32 %v1688_v7, %v1694_v40  ;;  %v576_v40 = vld [vmem:[#allocation4 + $0x18] sm:$0xff] }
 0x254   :  { %v1033_v43 = vmul.f32 0.0, %v969_v23  ;;  %v913_v11 = vmul.f32 0.6931472, %v1187_v54 }
 0x255   :  { %v1189_v60 = vpop.eup %1188  ;;  %834 = vst.msk [vmem:[#allocation4 + $0x28] sm:$0xff] %vm135_vm3, %v818_v32  ;;  %v611_v23 = vmul.f32 1.442695, %v1865_v13  ;;  %v587_v32 = vld [vmem:[#allocation4 + $0x70] sm:$0xff]  ;;  %v627_v41 = vmul.f32 1.442695, %v1866_v2 }
 0x256   :  { %v1191_v42 = vpop.eup %1190  ;;  %1049 = vst.msk [vmem:[%s1855_s2 + $0x48] sm:$0xff] %vm135_vm3, %v1033_v43  ;;  %v936_v48 = vadd.f32 %v913_v11, %v872_v36  ;;  %v909_v53 = vmul.f32 0.6931472, %v1189_v60  ;;  %v957_v11 = vld [vmem:[#allocation5 + $0x68] sm:$0xff]  ;;  %v583_v60 = vld [vmem:[#allocation4 + $0x50] sm:$0xff] }
 0x257   :  { %v650_v63 = vmul.f32 %v1191_v42, %v586_v55  ;;  %v874_v13 = vld [vmem:[#allocation3 + $0x50] sm:$0xff] }
 0x258   :  { %v968_v0 = vsub.f32 %v936_v48, %v952_v15  ;;  %v934_v3 = vadd.f32 %v909_v53, %v870_v29 }
 0x25a   :  { %v1032_v59 = vmul.f32 0.0, %v968_v0  ;;  %v966_v25 = vsub.f32 %v934_v3, %v950_v22  ;;  %v808_v6 = vpop.xlane.xlu0 %807  ;;  %v1867_v22 = vsub.f32 %v1652_v38, %v1657_v47 }
 0x25b   :  { %v826_v4 = vadd.f32 %v808_v6, %v650_v63 }
 0x25c   :  { %1048 = vst.msk [vmem:[%s1855_s2 + $0x40] sm:$0xff] %vm135_vm3, %v1032_v59  ;;  %v1030_v46 = vmul.f32 0.0, %v966_v25  ;;  %v885_v44 = vld [vmem:[#allocation4 + $0x28] sm:$0xff]  ;;  %v619_v63 = vmul.f32 1.442695, %v1867_v22 }
 0x25d   :  { %1192 = vlog2.f32 %v885_v44  ;;  %842 = vst.msk [vmem:[#allocation4 + $0x68] sm:$0xff] %vm135_vm3, %v826_v4  ;;  %v1868_v4 = vsub.f32 %v1587_v49, %v1592_v51  ;;  %v959_v51 = vld [vmem:[#allocation5 + $0x78] sm:$0xff] }
 0x25e   :  { %1046 = vst.msk [vmem:[%s1855_s2 + $0x30] sm:$0xff] %vm135_vm3, %v1030_v46  ;;  %1194 = vpow2.f32 %v635_v57  ;;  %v1869_v46 = vsub.f32 %v1530_v8, %v1533_v14 }
 0x25f   :  { %1196 = vpow2.f32 %v609_v58  ;;  %v607_v38 = vmul.f32 1.442695, %v1868_v4 }
 0x260   :  { %v605_v44 = vmul.f32 1.442695, %v1869_v46 }
 0x263   :  { %v1193_v10 = vpop.eup %1192 }
 0x264   :  { %v907_v34 = vmul.f32 0.6931472, %v1193_v10  ;;  %v893_v31 = vld [vmem:[#allocation4 + $0x68] sm:$0xff]  ;;  %v1195_v17 = vpop.eup %1194  ;;  %v879_v10 = vld [vmem:[#allocation3 + $0x78] sm:$0xff] }
 0x265   :  { %1198 = vlog2.f32 %v893_v31  ;;  %v1197_v37 = vpop.eup %1196  ;;  %v652_v27 = vmul.f32 %v1195_v17, %v588_v19  ;;  %v866_v31 = vld [vmem:[#allocation3 + $0x10] sm:$0xff] }
 0x266   :  { %v933_v12 = vadd.f32 %v907_v34, %v869_v62  ;;  %1200 = vpow2.f32 %v633_v21  ;;  %v639_v52 = vmul.f32 %v1197_v37, %v575_v18  ;;  %v584_v62 = vld [vmem:[#allocation4 + $0x58] sm:$0xff]  ;;  %v946_v19 = vld [vmem:[#allocation5 + $0x10] sm:$0xff] }
 0x267   :  { %1202 = vpow2.f32 %v625_v35  ;;  %v580_v35 = vld [vmem:[#allocation4 + $0x38] sm:$0xff] }
 0x268   :  { %v965_v20 = vsub.f32 %v933_v12, %v949_v24  ;;  %1204 = vpow2.f32 %v611_v23 }
 0x269   :  { %v812_v39 = vpop.xlane.xlu2 %811 }
 0x26a   :  { %v1029_v30 = vmul.f32 0.0, %v965_v20  ;;  %v828_v33 = vadd.f32 %v812_v39, %v652_v27  ;;  %v786_v28 = vpop.xlane.xlu1 %785 }
 0x26b   :  { %v1199_v5 = vpop.eup %1198  ;;  %v815_v50 = vadd.f32 %v786_v28, %v639_v52 }
 0x26c   :  { %1045 = vst.msk [vmem:[%s1855_s2 + $0x28] sm:$0xff] %vm135_vm3, %v1029_v30  ;;  %v923_v56 = vmul.f32 0.6931472, %v1199_v5  ;;  %v1201_v45 = vpop.eup %1200  ;;  %v878_v5 = vld [vmem:[#allocation3 + $0x70] sm:$0xff] }
 0x26d   :  { %844 = vst.msk [vmem:[#allocation4 + $0x78] sm:$0xff] %vm135_vm3, %v828_v33  ;;  %v1203_v43 = vpop.eup %1202  ;;  %v651_v42 = vmul.f32 %v1201_v45, %v587_v32  ;;  %v574_v45 = vld [vmem:[#allocation4 + $0x8] sm:$0xff]  ;;  %v958_v32 = vld [vmem:[#allocation5 + $0x70] sm:$0xff] }
 0x26e   :  { %v941_v54 = vadd.f32 %v923_v56, %v877_v16  ;;  %831 = vst.msk [vmem:[#allocation4 + $0x10] sm:$0xff] %vm135_vm3, %v815_v50  ;;  %v647_v53 = vmul.f32 %v1203_v43, %v583_v60  ;;  %v1205_v7 = vpop.eup %1204  ;;  %v954_v60 = vld [vmem:[#allocation5 + $0x50] sm:$0xff] }
 0x26f   :  { %v640_v25 = vmul.f32 %v1205_v7, %v576_v40 }
 0x270   :  { %v973_v36 = vsub.f32 %v941_v54, %v957_v11  ;;  %v573_v11 = vld [vmem:[#allocation4] sm:$0xff] }
 0x272   :  { %v1037_v48 = vmul.f32 0.0, %v973_v36  ;;  %v810_v55 = vpop.xlane.xlu1 %809 }
 0x273   :  { %v802_v15 = vpop.xlane.xlu0 %801  ;;  %v827_v29 = vadd.f32 %v810_v55, %v651_v42 }
 0x274   :  { %1053 = vst.msk [vmem:[%s1855_s2 + $0x68] sm:$0xff] %vm135_vm3, %v1037_v48  ;;  %v895_v0 = vld [vmem:[#allocation4 + $0x78] sm:$0xff]  ;;  %v823_v3 = vadd.f32 %v802_v15, %v647_v53 }
 0x275   :  { %1206 = vlog2.f32 %v895_v0  ;;  %v882_v59 = vld [vmem:[#allocation4 + $0x10] sm:$0xff]  ;;  %843 = vst.msk [vmem:[#allocation4 + $0x70] sm:$0xff] %vm135_vm3, %v827_v29 }
 0x276   :  { %1208 = vlog2.f32 %v882_v59  ;;  %839 = vst.msk [vmem:[#allocation4 + $0x50] sm:$0xff] %vm135_vm3, %v823_v3  ;;  %v867_v59 = vld [vmem:[#allocation3 + $0x18] sm:$0xff] }
 0x277   :  { %1210 = vpow2.f32 %v627_v41 }
 0x278   :  { %1212 = vpow2.f32 %v619_v63 }
 0x27b   :  { %v1207_v6 = vpop.eup %1206  ;;  %v788_v1 = vpop.xlane.xlu0 %787 }
 0x27c   :  { %v1209_v57 = vpop.eup %1208  ;;  %v927_v47 = vmul.f32 0.6931472, %v1207_v6  ;;  %v894_v26 = vld [vmem:[#allocation4 + $0x70] sm:$0xff]  ;;  %v816_v58 = vadd.f32 %v788_v1, %v640_v25  ;;  %v947_v25 = vld [vmem:[#allocation5 + $0x18] sm:$0xff] }
 0x27d   :  { %v901_v61 = vmul.f32 0.6931472, %v1209_v57  ;;  %v890_v21 = vld [vmem:[#allocation4 + $0x50] sm:$0xff]  ;;  %1214 = vlog2.f32 %v894_v26  ;;  %v1211_v34 = vpop.eup %1210  ;;  %v871_v26 = vld [vmem:[#allocation3 + $0x38] sm:$0xff] }
 0x27e   :  { %v943_v17 = vadd.f32 %v927_v47, %v879_v10  ;;  %1216 = vlog2.f32 %v890_v21  ;;  %832 = vst.msk [vmem:[#allocation4 + $0x18] sm:$0xff] %vm135_vm3, %v816_v58  ;;  %v1213_v49 = vpop.eup %1212  ;;  %v648_v14 = vmul.f32 %v1211_v34, %v584_v62  ;;  %v955_v34 = vld [vmem:[#allocation5 + $0x58] sm:$0xff] }
 0x27f   :  { %v930_v9 = vadd.f32 %v901_v61, %v866_v31  ;;  %1218 = vpow2.f32 %v607_v38  ;;  %v644_v18 = vmul.f32 %v1213_v49, %v580_v35  ;;  %v951_v61 = vld [vmem:[#allocation5 + $0x38] sm:$0xff] }
 0x280   :  { %v975_v37 = vsub.f32 %v943_v17, %v959_v51  ;;  %1220 = vpow2.f32 %v605_v44  ;;  %v875_v44 = vld [vmem:[#allocation3 + $0x58] sm:$0xff] }
 0x281   :  { %v962_v8 = vsub.f32 %v930_v9, %v946_v19  ;;  %v864_v19 = vld [vmem:[#allocation3] sm:$0xff] }
 0x282   :  { %v1039_v12 = vmul.f32 0.0, %v975_v37  ;;  %v804_v24 = vpop.xlane.xlu1 %803 }
 0x283   :  { %v1215_v20 = vpop.eup %1214  ;;  %v1026_v27 = vmul.f32 0.0, %v962_v8  ;;  %v796_v39 = vpop.xlane.xlu0 %795  ;;  %v824_v52 = vadd.f32 %v804_v24, %v648_v14  ;;  %v865_v8 = vld [vmem:[#allocation3 + $0x8] sm:$0xff] }
 0x284   :  { %v1217_v30 = vpop.eup %1216  ;;  %1055 = vst.msk [vmem:[%s1855_s2 + $0x78] sm:$0xff] %vm135_vm3, %v1039_v12  ;;  %v925_v33 = vmul.f32 0.6931472, %v1215_v20  ;;  %v820_v28 = vadd.f32 %v796_v39, %v644_v18  ;;  %v944_v12 = vld [vmem:[#allocation5] sm:$0xff]  ;;  %v945_v24 = vld [vmem:[#allocation5 + $0x8] sm:$0xff] }
 0x285   :  { %1042 = vst.msk [vmem:[%s1855_s2 + $0x10] sm:$0xff] %vm135_vm3, %v1026_v27  ;;  %v917_v50 = vmul.f32 0.6931472, %v1217_v30  ;;  %v883_v56 = vld [vmem:[#allocation4 + $0x18] sm:$0xff]  ;;  %v1219_v16 = vpop.eup %1218 }
 0x286   :  { %v942_v23 = vadd.f32 %v925_v33, %v878_v5  ;;  %1222 = vlog2.f32 %v883_v56  ;;  %836 = vst.msk [vmem:[#allocation4 + $0x38] sm:$0xff] %vm135_vm3, %v820_v28  ;;  %v1221_v54 = vpop.eup %1220  ;;  %v638_v48 = vmul.f32 %v1219_v16, %v574_v45 }
 0x287   :  { %v938_v43 = vadd.f32 %v917_v50, %v874_v13  ;;  %840 = vst.msk [vmem:[#allocation4 + $0x58] sm:$0xff] %vm135_vm3, %v824_v52  ;;  %v637_v55 = vmul.f32 %v1221_v54, %v573_v11 }
 0x288   :  { %v974_v36 = vsub.f32 %v942_v23, %v958_v32 }
 0x289   :  { %v970_v42 = vsub.f32 %v938_v43, %v954_v60 }
 0x28a   :  { %v1038_v53 = vmul.f32 0.0, %v974_v36  ;;  %v784_v15 = vpop.xlane.xlu1 %783 }
 0x28b   :  { %v1034_v29 = vmul.f32 0.0, %v970_v42  ;;  %v782_v2 = vpop.xlane.xlu0 %781  ;;  %v814_v41 = vadd.f32 %v784_v15, %v638_v48 }
 0x28c   :  { %v1223_v0 = vpop.eup %1222  ;;  %1054 = vst.msk [vmem:[%s1855_s2 + $0x70] sm:$0xff] %vm135_vm3, %v1038_v53  ;;  %v813_v3 = vadd.f32 %v782_v2, %v637_v55 }
 0x28d   :  { %1050 = vst.msk [vmem:[%s1855_s2 + $0x50] sm:$0xff] %vm135_vm3, %v1034_v29  ;;  %v903_v22 = vmul.f32 0.6931472, %v1223_v0  ;;  %v887_v63 = vld [vmem:[#allocation4 + $0x38] sm:$0xff] }
 0x28e   :  { %1224 = vlog2.f32 %v887_v63  ;;  %v891_v7 = vld [vmem:[#allocation4 + $0x58] sm:$0xff]  ;;  %829 = vst.msk [vmem:[#allocation4] sm:$0xff] %vm135_vm3, %v813_v3 }
 0x28f   :  { %v931_v40 = vadd.f32 %v903_v22, %v867_v59  ;;  %1226 = vlog2.f32 %v891_v7  ;;  %830 = vst.msk [vmem:[#allocation4 + $0x8] sm:$0xff] %vm135_vm3, %v814_v41 }
 0x291   :  { %v963_v6 = vsub.f32 %v931_v40, %v947_v25 }
 0x293   :  { %v1027_v1 = vmul.f32 0.0, %v963_v6 }
 0x294   :  { %v1225_v57 = vpop.eup %1224 }
 0x295   :  { %v1227_v4 = vpop.eup %1226  ;;  %1043 = vst.msk [vmem:[%s1855_s2 + $0x18] sm:$0xff] %vm135_vm3, %v1027_v1  ;;  %v911_v38 = vmul.f32 0.6931472, %v1225_v57  ;;  %v880_v47 = vld [vmem:[#allocation4] sm:$0xff] }
 0x296   :  { %v919_v58 = vmul.f32 0.6931472, %v1227_v4  ;;  %1228 = vlog2.f32 %v880_v47  ;;  %v881_v46 = vld [vmem:[#allocation4 + $0x8] sm:$0xff] }
 0x297   :  { %v935_v10 = vadd.f32 %v911_v38, %v871_v26  ;;  %1230 = vlog2.f32 %v881_v46 }
 0x298   :  { %v939_v21 = vadd.f32 %v919_v58, %v875_v44 }
 0x299   :  { %v967_v31 = vsub.f32 %v935_v10, %v951_v61 }
 0x29a   :  { %v971_v17 = vsub.f32 %v939_v21, %v955_v34 }
 0x29b   :  { %v1031_v62 = vmul.f32 0.0, %v967_v31 }
 0x29c   :  { %v1229_v49 = vpop.eup %1228  ;;  %v1035_v51 = vmul.f32 0.0, %v971_v17 }
 0x29d   :  { %v1231_v9 = vpop.eup %1230  ;;  %1047 = vst.msk [vmem:[%s1855_s2 + $0x38] sm:$0xff] %vm135_vm3, %v1031_v62  ;;  %v897_v35 = vmul.f32 0.6931472, %v1229_v49 }
 0x29e   :  { %1051 = vst.msk [vmem:[%s1855_s2 + $0x58] sm:$0xff] %vm135_vm3, %v1035_v51  ;;  %v899_v37 = vmul.f32 0.6931472, %v1231_v9 }
 0x29f   :  { %v928_v14 = vadd.f32 %v897_v35, %v864_v19 }
 0x2a0   :  { %v929_v18 = vadd.f32 %v899_v37, %v865_v8 }
 0x2a1   :  { %v960_v20 = vsub.f32 %v928_v14, %v944_v12 }
 0x2a2   :  { %v961_v27 = vsub.f32 %v929_v18, %v945_v24 }
 0x2a3   :  { %1040 = vst.msk [vmem:[%s1855_s2] sm:$0xff] %vm135_vm3, %v960_v20 }
 0x2a4   :  { %1041 = vst.msk [vmem:[%s1855_s2 + $0x8] sm:$0xff] %vm135_vm3, %v961_v27 }
 0x2a5   :  { %1060 = vsyncpa [#allocation7], 1 }
 0x2a6   :  { %1061 = vsyncpa [#allocation9], 1 }

</bundles_post_ra>
